<compile_context>
chip_gen: v7x
topology: tpu7x:2x2x1
jax: 0.10.0
libtpu: 0.0.40
codegen_flags: <defaults>
</compile_context>

<pallas_src>
import functools

import jax
import jax.numpy as jnp
from jax.experimental import pallas as pl
from jax.experimental.pallas import tpu as pltpu

N_EMBD = 384
HIDDEN = 4 * N_EMBD
DROPOUT_P = 0.2


def _ffn_kernel(*refs, apply_dropout: bool):
    if apply_dropout:
        x_ref, w1_ref, b1_ref, w2_ref, b2_ref, m_ref, o_ref = refs
    else:
        x_ref, w1_ref, b1_ref, w2_ref, b2_ref, o_ref = refs
        m_ref = None

    # Linear 1: bf16 MXU matmul with f32 accumulation; bias + ReLU in f32.
    h = jnp.dot(x_ref[...].astype(jnp.bfloat16), w1_ref[...],
                preferred_element_type=jnp.float32)
    h = jnp.maximum(h + b1_ref[...], 0.0)

    # Linear 2.
    y = jnp.dot(h.astype(jnp.bfloat16), w2_ref[...],
                preferred_element_type=jnp.float32)
    y = y + b2_ref[...]

    if apply_dropout:
        y = y * m_ref[...]  # inverted-dropout mask, already scaled by 1/(1-p)

    o_ref[...] = y.astype(o_ref.dtype)


def _pick_tile(m, tm_req):
    """Token tile: multiple of 8, capped at m; prefer >= 2 grid steps (v7x)."""
    tm = max(8, min(tm_req, m))
    tm = (tm // 8) * 8
    m_pad = pl.cdiv(m, tm) * tm
    if m_pad // tm < 2 and tm > 8 and (tm // 2) % 8 == 0:
        tm //= 2
        m_pad = pl.cdiv(m, tm) * tm
    return tm, m_pad


def feedforward(x, w1, b1, w2, b2, *, key=None, training=True, tm=256):
    """x: (B, T, C) float32. Returns (B, T, C)."""
    B, T, C = x.shape
    H = w1.shape[1]
    assert C == N_EMBD and H == HIDDEN
    M = B * T

    tm_eff, M_pad = _pick_tile(M, tm)

    x2 = x.reshape(M, C).astype(jnp.float32)
    if M_pad != M:
        x2 = jnp.pad(x2, ((0, M_pad - M), (0, 0)))

    # Weights in bf16 for the MXU; biases stay f32 for the accumulation path.
    w1b = w1.astype(jnp.bfloat16)
    w2b = w2.astype(jnp.bfloat16)
    b1f = b1.reshape(1, H).astype(jnp.float32)
    b2f = b2.reshape(1, C).astype(jnp.float32)

    act_spec = pl.BlockSpec((tm_eff, C), lambda i: (i, 0))
    resident = dict(pipeline_mode=pl.Buffered(1))  # constant index_map => 1 buffer

    inputs = [x2, w1b, b1f, w2b, b2f]
    in_specs = [
        act_spec,                                                     # x tile
        pl.BlockSpec((C, H), lambda i: (0, 0), **resident),           # W1
        pl.BlockSpec((1, H), lambda i: (0, 0), **resident),           # b1
        pl.BlockSpec((H, C), lambda i: (0, 0), **resident),           # W2
        pl.BlockSpec((1, C), lambda i: (0, 0), **resident),           # b2
    ]

    apply_dropout = bool(training) and DROPOUT_P > 0.0
    if apply_dropout:
        if key is None:
            key = jax.random.PRNGKey(0)
        keep = jax.random.bernoulli(key, 1.0 - DROPOUT_P, (M_pad, C))
        mask = keep.astype(jnp.float32) * (1.0 / (1.0 - DROPOUT_P))
        inputs.append(mask)
        in_specs.append(act_spec)

    kernel = functools.partial(_ffn_kernel, apply_dropout=apply_dropout)

    bytes_accessed = (2 * M_pad * C * 4                # x in, out
                      + (C * H + H * C) * 2            # bf16 weights
                      + (H + C) * 4                    # f32 biases
                      + (M_pad * C * 4 if apply_dropout else 0))
    cost = pl.CostEstimate(flops=4 * M_pad * C * H,
                           transcendentals=0,
                           bytes_accessed=bytes_accessed)

    out = pl.pallas_call(
        kernel,
        out_shape=jax.ShapeDtypeStruct((M_pad, C), x.dtype),
        grid_spec=pltpu.PrefetchScalarGridSpec(
            num_scalar_prefetch=0,
            grid=(M_pad // tm_eff,),
            in_specs=in_specs,
            out_specs=act_spec,
        ),
        compiler_params=pltpu.CompilerParams(
            dimension_semantics=("parallel",),
            vmem_limit_bytes=32 * 1024 * 1024),
        cost_estimate=cost,
    )(*inputs)

    return out[:M].reshape(B, T, C)


def init_params(key):
    """Deterministic init mirroring nn.Linear: U(-1/sqrt(fan_in), 1/sqrt(fan_in))."""
    k1, k2, k3, k4 = jax.random.split(key, 4)
    bound1 = 1.0 / (N_EMBD ** 0.5)
    bound2 = 1.0 / (HIDDEN ** 0.5)
    w1 = jax.random.uniform(k1, (N_EMBD, HIDDEN), jnp.float32, -bound1, bound1)
    b1 = jax.random.uniform(k2, (1, HIDDEN), jnp.float32, -bound1, bound1)
    w2 = jax.random.uniform(k3, (HIDDEN, N_EMBD), jnp.float32, -bound2, bound2)
    b2 = jax.random.uniform(k4, (1, N_EMBD), jnp.float32, -bound2, bound2)
    return w1, b1, w2, b2


if __name__ == "__main__":
    key = jax.random.PRNGKey(0)
    kp, kx, kd = jax.random.split(key, 3)
    w1, b1, w2, b2 = init_params(kp)

    B, T = 2, 8
    x = jax.random.normal(kx, (B, T, N_EMBD), jnp.float32)

    # Eval path (dropout = identity): check against a plain-JAX reference.
    y_eval = feedforward(x, w1, b1, w2, b2, training=False)
    y_eval = jax.block_until_ready(y_eval)

    x2 = x.reshape(-1, N_EMBD)
    ref = jnp.maximum(x2 @ w1 + b1, 0.0) @ w2 + b2
    ref = ref.reshape(B, T, N_EMBD)
    # bf16 MXU matmul vs f32 reference -> loose-but-meaningful tolerance.
    assert jnp.allclose(y_eval, ref, atol=5e-2, rtol=5e-2), "eval-path mismatch"

    # Training path (matches nn.Module default: dropout active).
    y_train = feedforward(x, w1, b1, w2, b2, key=kd, training=True)
    y_train = jax.block_until_ready(y_train)
    assert y_train.shape == (B, T, N_EMBD)
    assert bool(jnp.isfinite(y_train).all())

    print("KERNEL_OK")
</pallas_src>

<mosaic_0001>
module attributes {stable_mosaic.version = 11 : i64} {
  func.func @_ffn_kernel(%arg0: i32, %arg1: memref<8x384xf32, #tpu.memory_space<vmem>>, %arg2: memref<384x1536xbf16, #tpu.memory_space<vmem>>, %arg3: memref<1x1536xf32, #tpu.memory_space<vmem>>, %arg4: memref<1536x384xbf16, #tpu.memory_space<vmem>>, %arg5: memref<1x384xf32, #tpu.memory_space<vmem>>, %arg6: memref<8x384xf32, #tpu.memory_space<vmem>>) attributes {dimension_semantics = [#tpu.dimension_semantics<parallel>], iteration_bounds = array<i64: 2>, scalar_prefetch = 0 : i64, scratch_operands = 0 : i64, tpu.core_type = #tpu.core_type<tc>, window_params = [{transform_indices = @transform_0, window_bounds = array<i64: 8, 384>}, {pipeline_mode = #tpu.pipeline_mode<synchronous>, transform_indices = @transform_1, window_bounds = array<i64: 384, 1536>}, {pipeline_mode = #tpu.pipeline_mode<synchronous>, transform_indices = @transform_2, window_bounds = array<i64: 1, 1536>}, {pipeline_mode = #tpu.pipeline_mode<synchronous>, transform_indices = @transform_3, window_bounds = array<i64: 1536, 384>}, {pipeline_mode = #tpu.pipeline_mode<synchronous>, transform_indices = @transform_4, window_bounds = array<i64: 1, 384>}, {transform_indices = @transform_5, window_bounds = array<i64: 8, 384>}]} {
    %c0 = arith.constant 0 : index
    %c0_0 = arith.constant 0 : index
    %0 = vector.load %arg1[%c0, %c0_0] : memref<8x384xf32, #tpu.memory_space<vmem>>, vector<8x384xf32>
    %1 = arith.truncf %0 : vector<8x384xf32> to vector<8x384xbf16>
    %c0_1 = arith.constant 0 : index
    %c0_2 = arith.constant 0 : index
    %2 = vector.load %arg2[%c0_1, %c0_2] : memref<384x1536xbf16, #tpu.memory_space<vmem>>, vector<384x1536xbf16>
    %cst = arith.constant dense<0.000000e+00> : vector<8x1536xf32>
    %3 = tpu.matmul %1, %2, %cst {dimension_numbers = #tpu.dot_dimension_numbers<[1], [0], [0], [1], [0, 0, 1, 1], [], []>} : vector<8x384xbf16>, vector<384x1536xbf16>, vector<8x1536xf32> -> vector<8x1536xf32>
    %c0_3 = arith.constant 0 : index
    %c0_4 = arith.constant 0 : index
    %4 = vector.load %arg3[%c0_3, %c0_4] : memref<1x1536xf32, #tpu.memory_space<vmem>>, vector<1x1536xf32>
    %5 = vector.broadcast %4 : vector<1x1536xf32> to vector<8x1536xf32>
    %6 = arith.addf %3, %5 : vector<8x1536xf32>
    %cst_5 = arith.constant 0.000000e+00 : f32
    %7 = vector.broadcast %cst_5 : f32 to vector<8x1536xf32>
    %8 = arith.maximumf %6, %7 : vector<8x1536xf32>
    %9 = arith.truncf %8 : vector<8x1536xf32> to vector<8x1536xbf16>
    %c0_6 = arith.constant 0 : index
    %c0_7 = arith.constant 0 : index
    %10 = vector.load %arg4[%c0_6, %c0_7] : memref<1536x384xbf16, #tpu.memory_space<vmem>>, vector<1536x384xbf16>
    %cst_8 = arith.constant dense<0.000000e+00> : vector<8x384xf32>
    %11 = tpu.matmul %9, %10, %cst_8 {dimension_numbers = #tpu.dot_dimension_numbers<[1], [0], [0], [1], [0, 0, 1, 1], [], []>} : vector<8x1536xbf16>, vector<1536x384xbf16>, vector<8x384xf32> -> vector<8x384xf32>
    %c0_9 = arith.constant 0 : index
    %c0_10 = arith.constant 0 : index
    %12 = vector.load %arg5[%c0_9, %c0_10] : memref<1x384xf32, #tpu.memory_space<vmem>>, vector<1x384xf32>
    %13 = vector.broadcast %12 : vector<1x384xf32> to vector<8x384xf32>
    %14 = arith.addf %11, %13 : vector<8x384xf32>
    %c0_11 = arith.constant 0 : index
    %c0_12 = arith.constant 0 : index
    %15 = vector.load %arg6[%c0_11, %c0_12] : memref<8x384xf32, #tpu.memory_space<vmem>>, vector<8x384xf32>
    tpu.vector_store %arg6[%c0_11, %c0_12], %14 {strides = array<i32>} : memref<8x384xf32, #tpu.memory_space<vmem>>, vector<8x384xf32>,
    return
  }
  func.func @transform_0(%arg0: i32) -> (i32, i32) {
    %c0_i32 = arith.constant 0 : i32
    %c0_i32_0 = arith.constant 0 : i32
    return %arg0, %c0_i32 : i32, i32
  }
  func.func @transform_1(%arg0: i32) -> (i32, i32) {
    %c0_i32 = arith.constant 0 : i32
    %c0_i32_0 = arith.constant 0 : i32
    %c0_i32_1 = arith.constant 0 : i32
    return %c0_i32, %c0_i32_0 : i32, i32
  }
  func.func @transform_2(%arg0: i32) -> (i32, i32) {
    %c0_i32 = arith.constant 0 : i32
    %c0_i32_0 = arith.constant 0 : i32
    %c0_i32_1 = arith.constant 0 : i32
    return %c0_i32, %c0_i32_0 : i32, i32
  }
  func.func @transform_3(%arg0: i32) -> (i32, i32) {
    %c0_i32 = arith.constant 0 : i32
    %c0_i32_0 = arith.constant 0 : i32
    %c0_i32_1 = arith.constant 0 : i32
    return %c0_i32, %c0_i32_0 : i32, i32
  }
  func.func @transform_4(%arg0: i32) -> (i32, i32) {
    %c0_i32 = arith.constant 0 : i32
    %c0_i32_0 = arith.constant 0 : i32
    %c0_i32_1 = arith.constant 0 : i32
    return %c0_i32, %c0_i32_0 : i32, i32
  }
  func.func @transform_5(%arg0: i32) -> (i32, i32) {
    %c0_i32 = arith.constant 0 : i32
    %c0_i32_0 = arith.constant 0 : i32
    return %arg0, %c0_i32 : i32, i32
  }
}

</mosaic_0001>

<bundles_post_ra>
// kernel: tpu_custom_call.1
= control target key start
LH: loop header
LB: loop body
LE: loop exit
PB: predicated region body
PF: predicated region fallthrough
CT: control target
= control target key end

     0   :  { %10 = vsyncpa [#allocation3], 0  ;;  %s7509_s0 = inlined_call_operand.hbm [shape: f32[16,384], index: 0, kind: input, shape index: {}]   ;;  %s7510_s1 = inlined_call_operand.hbm [shape: bf16[384,1536], index: 1, kind: input, shape index: {}]   ;;  %s7511_s2 = inlined_call_operand.hbm [shape: f32[1,1536], index: 2, kind: input, shape index: {}]   ;;  %s7512_s3 = inlined_call_operand.hbm [shape: bf16[1536,384], index: 3, kind: input, shape index: {}]   ;;  %s7513_s4 = inlined_call_operand.hbm [shape: f32[1,384], index: 4, kind: input, shape index: {}]   ;;  %s7514_s5 = inlined_call_operand.hbm [shape: f32[16,384], index: 5, kind: output, shape index: {}]  }
   0x1   :  { %12 = vsyncpa [#allocation3 + $0x1], 0 }
   0x2   :  { %13 = vsyncpa [#allocation6], 0 }
   0x3   :  { %14 = vsyncpa [#allocation9], 0 }
   0x4   :  { %15 = vsyncpa [#allocation4], 0 }
   0x5   :  { %17 = vsyncpa [#allocation4 + $0x1], 0  ;;  %s7113_s18 = smov 0   ;;  %s7115_s19 = smov 0  }
   0x6   :  { %s7117_s20 = smov 0   ;;  %s7119_s21 = smov 0  }
   0x7 LB: > { %s7072_s22 = smov [#allocation5]   ;;  %s7134_s24 = sadd.s32 4294967295, %s7070_s21   ;;  %s7070_s21 = sphi %s7119_s21, %s7537_s21   ;;  %s7066_s20 = sphi %s7117_s20, %s7536_s20   ;;  %s7062_s19 = sphi %s7115_s19, %s7535_s19   ;;  %s7058_s18 = sphi %s7113_s18, %s7534_s18  }
   0x8   : > { %s176_s23 = sshll.u32 %s7072_s22, 4  ;;  %p5160_p0 = scmp.ge.s32.totalorder %s7070_s21, 1  ;;  %s7139_s23 = int_to_ptr.vmem [resolvable:$true] %s176_s23 }
   0x9   : > { %p7515_p1 = scmp.eq.s32.totalorder %s7134_s24, 0  ;;  %p164_p2 = scmp.lt.s32.totalorder %s7070_s21, 3 }
   0xa   : > { %s7073_s26 = smov [#allocation8]   ;;  %s7074_s29 = smov [#allocation7]  }
   0xb   : > { %p7141_p3 = pnand %p5160_p0, %p164_p2  ;;  %s200_s27 = sshll.u32 %s7073_s26, 4  ;;  %s7154_s27 = int_to_ptr.vmem [resolvable:$true] %s200_s27 }
   0xc   : > { %s7156_s30 = sshll.u32 %s7074_s29, 4  ;;  %s6854_s8 = scalar_lea.hbm %s7510_s1, 36864  ;;  %s191_s30 = int_to_ptr.vmem [resolvable:$true] %s7156_s30 }
   0xd   : > { %s7518_s25 = scalar_select %p7141_p3, 1, 0 }
   0xe   : > { %p5965_p5 = pneg %p7141_p3  ;;  %p6855_p7 = scmp.ne.s32.totalorder %s7510_s1, %s6854_s8 }
   0xf   : > { %p6861_p11 = scmp.lt.u32.totalorder %s6854_s8, %s7510_s1 }
  0x10   : > { %p7150_p6 = pnand %p5965_p5, %p7515_p1 }
  0x12   : > { %p7166_p8 = pneg %p7150_p6 }
  0x14   : > { %p6857_p9 = pnand %p7166_p8, %p6855_p7 }
  0x16   : > { %p6858_p10 = pneg %p6857_p9 }
  0x18   : > { %p6863_p12 = pnand %p6861_p11, %p6858_p10 }
  0x1a   : > { %6866 = shalt.err (!%p6863_p12)
}
  0x1b   : > { %s6867_s14 = scalar_lea.vmem %s7139_s23, 36864  ;;  %p6875_p5 = scmp.lt.s32.totalorder %s7139_s23, %s7139_s23 }
  0x1c   : > { %p6868_p13 = scmp.ne.s32.totalorder %s7139_s23, %s6867_s14  ;;  %p6876_p4 = scmp.lt.s32.totalorder %s6867_s14, %s6867_s14 }
  0x1e   : > { %p6870_p0 = pnand %p6868_p13, %p7166_p8  ;;  %p6877_p7 = por %p6876_p4, %p6875_p5 }
  0x20   : > { %p6871_p2 = pneg %p6870_p0 }
  0x22   : > { %p6878_p9 = pnand %p6877_p7, %p6871_p2 }
  0x24   : > { %6881 = shalt.err (!%p6878_p9)
}
  0x25   : > { %s7075_s15 = smov 768   ;;  %s7076_s16 = smov 48  }
  0x26   : > { %5968 = dma.hbm_to_vmem [thread:$0]  (!%p7150_p6), %s7510_s1, 36864, %s7139_s23, [#allocation6], %s7075_s15, %s7075_s15, %s7076_s16  }
  0x27   : > { %s6882_s6 = scalar_lea.hbm %s7512_s3, 36864 }
  0x28   : > { %p6883_p4 = scmp.ne.s32.totalorder %s7512_s3, %s6882_s6  ;;  %p6889_p12 = scmp.lt.u32.totalorder %s6882_s6, %s7512_s3 }
  0x2a   : > { %p6885_p10 = pnand %p6883_p4, %p7166_p8 }
  0x2c   : > { %p6886_p11 = pneg %p6885_p10 }
  0x2e   : > { %p6891_p13 = pnand %p6889_p12, %p6886_p11 }
  0x30   : > { %6894 = shalt.err (!%p6891_p13)
}
  0x31   : > { %s6895_s23 = scalar_lea.vmem %s7154_s27, 36864  ;;  %p6903_p7 = scmp.lt.s32.totalorder %s7154_s27, %s7154_s27 }
  0x32   : > { %p6896_p0 = scmp.ne.s32.totalorder %s7154_s27, %s6895_s23  ;;  %p6904_p9 = scmp.lt.s32.totalorder %s6895_s23, %s6895_s23 }
  0x34   : > { %p6898_p2 = pnand %p6896_p0, %p7166_p8  ;;  %p6905_p4 = por %p6904_p9, %p6903_p7 }
  0x36   : > { %p6899_p5 = pneg %p6898_p2 }
  0x38   : > { %p6906_p10 = pnand %p6905_p4, %p6899_p5 }
  0x3a   : > { %6909 = shalt.err (!%p6906_p10)
}
  0x3b   : > { %s7077_s12 = smov 192   ;;  %s7078_s13 = smov 12  }
  0x3c   : > { %5974 = dma.hbm_to_vmem [thread:$0]  (!%p7150_p6), %s7512_s3, 36864, %s7154_s27, [#allocation9], %s7077_s12, %s7077_s12, %s7078_s13  }
  0x3d   : > { %s6910_s22 = scalar_lea.hbm %s7511_s2, 192 }
  0x3e   : > { %p6911_p11 = scmp.ne.s32.totalorder %s7511_s2, %s6910_s22  ;;  %p6917_p0 = scmp.lt.u32.totalorder %s6910_s22, %s7511_s2 }
  0x40   : > { %p6913_p12 = pnand %p6911_p11, %p7166_p8 }
  0x42   : > { %p6914_p13 = pneg %p6913_p12 }
  0x44   : > { %p6919_p2 = pnand %p6917_p0, %p6914_p13 }
  0x46   : > { %6922 = shalt.err (!%p6919_p2)
}
  0x47   : > { %s6923_s8 = scalar_lea.vmem %s191_s30, 192  ;;  %p6931_p4 = scmp.lt.s32.totalorder %s191_s30, %s191_s30 }
  0x48   : > { %p6924_p5 = scmp.ne.s32.totalorder %s191_s30, %s6923_s8  ;;  %p6932_p10 = scmp.lt.s32.totalorder %s6923_s8, %s6923_s8 }
  0x4a   : > { %p6926_p7 = pnand %p6924_p5, %p7166_p8  ;;  %p6933_p1 = por %p6932_p10, %p6931_p4 }
  0x4c   : > { %p6927_p9 = pneg %p6926_p7 }
  0x4e   : > { %p6934_p3 = pnand %p6933_p1, %p6927_p9 }
  0x50   : > { %6937 = shalt.err (!%p6934_p3)
}
  0x51   : > { %5971 = dma.hbm_to_vmem [thread:$0]  (!%p7150_p6), %s7511_s2, 192, %s191_s30, [#allocation6]  }
  0x52   : > { %s7079_s10 = smov [#allocation10]   ;;  %s6938_s14 = scalar_lea.hbm %s7513_s4, 48 }
  0x53   : > { %s214_s23 = sshll.u32 %s7079_s10, 4  ;;  %p6939_p11 = scmp.ne.s32.totalorder %s7513_s4, %s6938_s14  ;;  %s215_s23 = int_to_ptr.vmem [resolvable:$true] %s214_s23 }
  0x54   : > { %p6945_p12 = scmp.lt.u32.totalorder %s6938_s14, %s7513_s4 }
  0x55   : > { %p6941_p1 = pnand %p6939_p11, %p7166_p8 }
  0x57   : > { %p6942_p3 = pneg %p6941_p1 }
  0x59   : > { %p6947_p13 = pnand %p6945_p12, %p6942_p3 }
  0x5b   : > { %6950 = shalt.err (!%p6947_p13)
}
  0x5c   : > { %s6951_s30 = scalar_lea.vmem %s215_s23, 48  ;;  %s6958_s26 = scalar_lea.vmem %s215_s23, 64 }
  0x5d   : > { %p6952_p0 = scmp.ne.s32.totalorder %s215_s23, %s6951_s30  ;;  %p6959_p7 = scmp.lt.s32.totalorder %s215_s23, %s215_s23 }
  0x5e   : > { %p6960_p9 = scmp.lt.s32.totalorder %s6958_s26, %s6951_s30 }
  0x5f   : > { %p6954_p2 = pnand %p6952_p0, %p7166_p8 }
  0x60   : > { %p6961_p4 = por %p6960_p9, %p6959_p7 }
  0x61   : > { %p6955_p5 = pneg %p6954_p2 }
  0x63   : > { %p6962_p10 = pnand %p6961_p4, %p6955_p5 }
  0x65   : > { %6965 = shalt.err (!%p6962_p10)
}
  0x66   : > { %5977 = dma.hbm_to_vmem [thread:$0]  (!%p7150_p6), %s7513_s4, 48, %s215_s23, [#allocation9]  }
  0x67   : > { %s5159_s11 = sadd.s32 4294967294, %s7070_s21   ;;  %s7249_s28 = sadd.s32 1, %s7070_s21  }
  0x68   : > { %s27_s7 = ssub.s32 %s7070_s21, %s7249_s28  ;;  %s30_s8 = sadd.s32 1, %s7066_s20 }
  0x69   : > { %p28_p8 = scmp.eq.s32.totalorder %s27_s7, 0  ;;  %p37_p11 = scmp.ne.s32.totalorder %s7066_s20, %s7062_s19 }
  0x6a   : > { %p38_p1 = scmp.eq.s32.totalorder %s7070_s21, 0  ;;  %p43_p3 = scmp.ne.s32.totalorder %s7062_s19, %s7058_s18 }
  0x6b   : > { %s7260_s27 = scalar_select %p28_p8, %s7066_s20, %s30_s8  }
  0x6c   : > { %p39_p12 = por %p38_p1, %p37_p11  ;;  %p7521_p13 = scmp.eq.s32.totalorder %s7134_s24, 0 }
  0x6d   : > { %p151_p6 = scmp.eq.s32.totalorder %s7134_s24, 1  ;;  %p157_p2 = scmp.eq.s32.totalorder %s5159_s11, 1 }
  0x6e   : > { %p7264_p0 = por %p7521_p13, %p43_p3  ;;  %p5990_p5 = scmp.lt.s32.totalorder %s7070_s21, 2 }
  0x6f   : > { %s225_s10 = sand.u32 1, %s7066_s20   ;;  %p7271_p7 = por %p151_p6, %p37_p11 }
  0x70   : > { %p7275_p9 = por %p157_p2, %p43_p3  ;;  %s5941_s13 = smul.u32 24, %s225_s10 }
  0x71   : > { %s7523_s23 = scalar_select %p7271_p7, 1, 0 }
  0x72   : > { %s7524_s12 = scalar_select %p7275_p9, 1, 0 }
  0x73   : > { %s5942_s14 = smul.u32 384, %s7070_s21  ;;  %p7280_p4 = pnand %p5990_p5, %p39_p12 }
  0x74   : > { %s229_s30 = scalar_lea.vmem [#allocation2], %s5941_s13  ;;  %s226_s29 = scalar_lea.sflag [#allocation3], %s225_s10 }
  0x75   : > { %s7287_s22 = scalar_lea.hbm %s7509_s0, %s5942_s14  ;;  %s237_s26 = sshll.u32 %s229_s30, 4  ;;  %s7289_s26 = int_to_ptr.vmem [resolvable:$true] %s237_s26 }
  0x76   : > { %s6966_s6 = scalar_lea.hbm %s7287_s22, 384  ;;  %p6968_p8 = pneg %p7280_p4 }
  0x77   : > { %p6967_p10 = scmp.ne.s32.totalorder %s7287_s22, %s6966_s6  ;;  %s6971_s8 = scalar_lea.hbm %s7509_s0, 768 }
  0x78   : > { %p6972_p3 = scmp.lt.u32.totalorder %s7287_s22, %s7509_s0  ;;  %p6973_p12 = scmp.lt.u32.totalorder %s6971_s8, %s6966_s6 }
  0x79   : > { %p6969_p11 = pnand %p6968_p8, %p6967_p10  ;;  %p6975_p6 = scmp.lt.u32.totalorder %s6966_s6, %s7287_s22 }
  0x7a   : > { %p6974_p13 = por %p6973_p12, %p6972_p3 }
  0x7b   : > { %p6970_p1 = pneg %p6969_p11 }
  0x7c   : > { %p6976_p2 = por %p6975_p6, %p6974_p13 }
  0x7e   : > { %p6977_p5 = pnand %p6976_p2, %p6970_p1 }
  0x80   : > { %6980 = shalt.err (!%p6977_p5)
}
  0x81   : > { %s6981_s10 = scalar_lea.vmem %s7289_s26, 384  ;;  %s7080_s13 = smov [#allocation2]  }
  0x82   : > { %p6982_p10 = scmp.ne.s32.totalorder %s7289_s26, %s6981_s10  ;;  %s6986_s17 = sshll.u32 %s7080_s13, 4  ;;  %s6987_s17 = int_to_ptr.vmem [resolvable:$false] %s6986_s17 }
  0x83   : > { %s6988_s30 = scalar_lea.vmem %s6987_s17, 768  ;;  %p6989_p7 = scmp.lt.s32.totalorder %s7289_s26, %s6987_s17 }
  0x84   : > { %p6984_p11 = pnand %p6982_p10, %p6968_p8  ;;  %p6990_p3 = scmp.lt.s32.totalorder %s6988_s30, %s6981_s10 }
  0x86   : > { %p6985_p9 = pneg %p6984_p11  ;;  %p6991_p12 = por %p6990_p3, %p6989_p7 }
  0x88   : > { %p6992_p13 = pnand %p6991_p12, %p6985_p9 }
  0x8a   : > { %6995 = shalt.err (!%p6992_p13)
}
  0x8b   : > { %5981 = dma.hbm_to_vmem [thread:$0]  (!%p7280_p4), %s7287_s22, 384, %s7289_s26, %s226_s29  }
  0x8c   : > { %p7526_p1 = scmp.ne.s32.totalorder %s7518_s25, 0 }
  0x8d   : > { %s7319_s6 = sand.u32 (!%p7526_p1), 1, %s7062_s19  }
  0x8e   : > { %246 = sbr.rel (%p7526_p1) target bundleno = 1054 (0x41e), region = 40  ;;  %s249_s7 = scalar_lea.sflag (!%p7526_p1), [#allocation3], %s7319_s6 }
  0x8f   : > { %s5943_s11 = smul.u32 (!%p7526_p1), 24, %s7319_s6 }
  0x91   : > { %s7325_s8 = scalar_lea.vmem (!%p7526_p1), [#allocation2], %s5943_s11 }
  0x95   : > { %7041 = dma.done.wait (%p7264_p0), %s249_s7, 384  }
  0x96   : > { %7043 = vsyncadd (%p7264_p0), %s249_s7, 4294966912  ;;  %p7527_p7 = scmp.eq.s32.totalorder %s7134_s24, 0 }
  0x98   : > { %7045 = dma.done.wait (%p7527_p7), [#allocation6], 37056   ;;  %p7528_p9 = pmov %p7527_p7 }
  0x99   : > { %p7529_p4 = pmov %p7527_p7 }
  0x9a   : > { %7047 = vsyncadd (%p7528_p9), [#allocation6], 4294930240 }
  0x9b   : > { %7049 = dma.done.wait (%p7529_p4), [#allocation9], 36912   ;;  %p7530_p8 = pmov %p7529_p4 }
  0x9c   : > { %v6037_v0 = vld [vmem:[#allocation5 + $0x4] ss:$48 sps:$4 sm:$0xff]   ;;  %v6039_v1 = vld [vmem:[#allocation5] ss:$48 sps:$4 sm:$0xff]   ;;  %s294_s25 = scalar_lea.vmem [#allocation11], %s5943_s11  ;;  %s5944_s9 = smul.u32 384, %s7134_s24 }
  0x9d   : > { %7051 = vsyncadd (%p7530_p8), [#allocation9], 4294930384  ;;  %2094 = vmatprep.subr.bf16.mxu1 %v6037_v0  ;;  %v6040_v2 = vld [vmem:[#allocation5 + $0x64] ss:$48 sps:$4 sm:$0xff]   ;;  %v6042_v3 = vld [vmem:[#allocation5 + $0x60] ss:$48 sps:$4 sm:$0xff]  }
  0x9e   : > { %2095 = vmatpush1.bf16.msra.mxu1 %v6039_v1  ;;  %v6043_v4 = vld [vmem:[#allocation5 + $0xc4] ss:$48 sps:$4 sm:$0xff]   ;;  %v6045_v5 = vld [vmem:[#allocation5 + $0xc0] ss:$48 sps:$4 sm:$0xff]   ;;  %v7081_v1 = vmov 0   ;;  %s5051_s15 = sshll.u32 %s294_s25, 4  ;;  %s7465_s29 = scalar_lea.hbm %s7514_s5, %s5944_s9  ;;  %s7467_s15 = int_to_ptr.vmem [resolvable:$true] %s5051_s15 }
  0x9f   : > { %2096 = vmatprep.subr.bf16.mxu1 %v6040_v2  ;;  %v6046_v6 = vld [vmem:[#allocation5 + $0x124] ss:$48 sps:$4 sm:$0xff]   ;;  %v6048_v7 = vld [vmem:[#allocation5 + $0x120] ss:$48 sps:$4 sm:$0xff]   ;;  %s5037_s24 = scalar_lea.sflag [#allocation4], %s7319_s6  ;;  %s6996_s14 = scalar_lea.vmem %s7467_s15, 384 }
  0xa0   : > { %v6049_v8 = vld [vmem:[#allocation5 + $0x184] ss:$48 sps:$4 sm:$0xff]   ;;  %v6051_v9 = vld [vmem:[#allocation5 + $0x180] ss:$48 sps:$4 sm:$0xff]   ;;  %p6997_p0 = scmp.ne.s32.totalorder %s7467_s15, %s6996_s14  ;;  %p7531_p6 = scmp.ne.s32.totalorder %s7523_s23, 0 }
  0xa1   : > { %v6052_v10 = vld [vmem:[#allocation5 + $0x1e4] ss:$48 sps:$4 sm:$0xff]   ;;  %v6054_v11 = vld [vmem:[#allocation5 + $0x1e0] ss:$48 sps:$4 sm:$0xff]   ;;  %s7082_s16 = smov [#allocation11]  }
  0xa2   : > { %2097 = vmatpush1.bf16.msra.mxu1 %v6042_v3  ;;  %v6055_v12 = vld [vmem:[#allocation5 + $0x244] ss:$48 sps:$4 sm:$0xff]   ;;  %v6084_v14 = vld [vmem:[#allocation5 + $0x10] ss:$48 sps:$4 sm:$0xff]   ;;  %p6998_p2 = pnand %p6997_p0, %p7531_p6  ;;  %s7000_s10 = sshll.u32 %s7082_s16, 4  ;;  %s7001_s10 = int_to_ptr.vmem [resolvable:$false] %s7000_s10 }
  0xa3   : > { %2098 = vmatprep.subr.bf16.mxu1 %v6043_v4  ;;  %v6082_v13 = vld [vmem:[#allocation5 + $0x14] ss:$48 sps:$4 sm:$0xff]   ;;  %v6057_v15 = vld [vmem:[#allocation5 + $0x240] ss:$48 sps:$4 sm:$0xff]   ;;  %s7002_s13 = scalar_lea.vmem %s7001_s10, 768  ;;  %p7003_p10 = scmp.lt.s32.totalorder %s7467_s15, %s7001_s10 }
  0xa4   : > { %v6058_v16 = vld [vmem:[#allocation5 + $0x2a4] ss:$48 sps:$4 sm:$0xff]   ;;  %2258 = vmatprep.subr.bf16.mxu0 %v6082_v13  ;;  %v6090_v18 = vld [vmem:[#allocation5 + $0x70] ss:$48 sps:$4 sm:$0xff]   ;;  %p6999_p5 = pneg %p6998_p2  ;;  %p7004_p11 = scmp.lt.s32.totalorder %s7002_s13, %s6996_s14 }
  0xa5   : > { %2259 = vmatpush1.bf16.msra.mxu0 %v6084_v14  ;;  %v6088_v17 = vld [vmem:[#allocation5 + $0x74] ss:$48 sps:$4 sm:$0xff]   ;;  %v6060_v20 = vld [vmem:[#allocation5 + $0x2a0] ss:$48 sps:$4 sm:$0xff]  }
  0xa6   : > { %2099 = vmatpush1.bf16.msra.mxu1 %v6045_v5  ;;  %v297_v19 = vld [vmem:[%s7325_s8 + $0x8] sm:$0xff]  ;;  %2260 = vmatprep.subr.bf16.mxu0 %v6088_v17  ;;  %v296_v55 = vld [vmem:[%s7325_s8] sm:$0xff]  ;;  %p7005_p3 = por %p7004_p11, %p7003_p10 }
  0xa7   : > { %2100 = vmatprep.subr.bf16.mxu1 %v6046_v6  ;;  %v7340_v21 = vpack.c.bf16 %v297_v19, %v297_v19  ;;  %v6094_v22 = vld [vmem:[#allocation5 + $0xd4] ss:$48 sps:$4 sm:$0xff]   ;;  %v6096_v23 = vld [vmem:[#allocation5 + $0xd0] ss:$48 sps:$4 sm:$0xff]   ;;  %v7345_v59 = vpack.c.bf16 %v296_v55, %v296_v55 }
  0xa8   : > { %v6061_v24 = vld [vmem:[#allocation5 + $0x304] ss:$48 sps:$4 sm:$0xff]   ;;  %v6063_v26 = vld [vmem:[#allocation5 + $0x300] ss:$48 sps:$4 sm:$0xff]   ;;  %p7006_p12 = pnand %p7005_p3, %p6999_p5 }
  0xa9   : > { %2261 = vmatpush1.bf16.msra.mxu0 %v6090_v18  ;;  %2126 = vmatprep.mubr.bf16.mxu1 %v7340_v21  ;;  %v6100_v25 = vld [vmem:[#allocation5 + $0x134] ss:$48 sps:$4 sm:$0xff]   ;;  %v6102_v27 = vld [vmem:[#allocation5 + $0x130] ss:$48 sps:$4 sm:$0xff]  }
  0xaa   : > { %2101 = vmatpush1.bf16.msra.mxu1 %v6048_v7  ;;  %2262 = vmatprep.subr.bf16.mxu0 %v6094_v22  ;;  %v6064_v28 = vld [vmem:[#allocation5 + $0x364] ss:$48 sps:$4 sm:$0xff]   ;;  %v6066_v30 = vld [vmem:[#allocation5 + $0x360] ss:$48 sps:$4 sm:$0xff]  }
  0xab   : > { %2102 = vmatprep.subr.bf16.mxu1 %v6049_v8  ;;  %2290 = vmatprep.mubr.bf16.mxu0 %v7340_v21  ;;  %v6106_v29 = vld [vmem:[#allocation5 + $0x194] ss:$48 sps:$4 sm:$0xff]   ;;  %v6108_v31 = vld [vmem:[#allocation5 + $0x190] ss:$48 sps:$4 sm:$0xff]  }
  0xac   : > { %v6067_v32 = vld [vmem:[#allocation5 + $0x3c4] ss:$48 sps:$4 sm:$0xff]   ;;  %v6069_v34 = vld [vmem:[#allocation5 + $0x3c0] ss:$48 sps:$4 sm:$0xff]  }
  0xad   : > { %2263 = vmatpush1.bf16.msra.mxu0 %v6096_v23  ;;  %v6112_v33 = vld [vmem:[#allocation5 + $0x1f4] ss:$48 sps:$4 sm:$0xff]   ;;  %v6114_v35 = vld [vmem:[#allocation5 + $0x1f0] ss:$48 sps:$4 sm:$0xff]  }
  0xae   : > { %2103 = vmatpush1.bf16.msra.mxu1 %v6051_v9  ;;  %2264 = vmatprep.subr.bf16.mxu0 %v6100_v25  ;;  %v6070_v36 = vld [vmem:[#allocation5 + $0x424] ss:$48 sps:$4 sm:$0xff]   ;;  %v6072_v38 = vld [vmem:[#allocation5 + $0x420] ss:$48 sps:$4 sm:$0xff]  }
  0xaf   : > { %2104 = vmatprep.subr.bf16.mxu1 %v6052_v10  ;;  %v6118_v37 = vld [vmem:[#allocation5 + $0x254] ss:$48 sps:$4 sm:$0xff]   ;;  %v6120_v39 = vld [vmem:[#allocation5 + $0x250] ss:$48 sps:$4 sm:$0xff]  }
  0xb0   : > { %v6073_v40 = vld [vmem:[#allocation5 + $0x484] ss:$48 sps:$4 sm:$0xff]   ;;  %v6075_v42 = vld [vmem:[#allocation5 + $0x480] ss:$48 sps:$4 sm:$0xff]  }
  0xb1   : > { %2265 = vmatpush1.bf16.msra.mxu0 %v6102_v27  ;;  %v6124_v41 = vld [vmem:[#allocation5 + $0x2b4] ss:$48 sps:$4 sm:$0xff]   ;;  %v6126_v43 = vld [vmem:[#allocation5 + $0x2b0] ss:$48 sps:$4 sm:$0xff]  }
  0xb2   : > { %2105 = vmatpush1.bf16.msra.mxu1 %v6054_v11  ;;  %2266 = vmatprep.subr.bf16.mxu0 %v6106_v29  ;;  %v6076_v44 = vld [vmem:[#allocation5 + $0x4e4] ss:$48 sps:$4 sm:$0xff]   ;;  %v6078_v46 = vld [vmem:[#allocation5 + $0x4e0] ss:$48 sps:$4 sm:$0xff]  }
  0xb3   : > { %2106 = vmatprep.subr.bf16.mxu1 %v6055_v12  ;;  %v6130_v45 = vld [vmem:[#allocation5 + $0x314] ss:$48 sps:$4 sm:$0xff]   ;;  %v6132_v47 = vld [vmem:[#allocation5 + $0x310] ss:$48 sps:$4 sm:$0xff]  }
  0xb4   : > { %v6079_v48 = vld [vmem:[#allocation5 + $0x544] ss:$48 sps:$4 sm:$0xff]   ;;  %v6081_v50 = vld [vmem:[#allocation5 + $0x540] ss:$48 sps:$4 sm:$0xff]  }
  0xb5   : > { %2267 = vmatpush1.bf16.msra.mxu0 %v6108_v31  ;;  %v6136_v49 = vld [vmem:[#allocation5 + $0x374] ss:$48 sps:$4 sm:$0xff]   ;;  %v6138_v51 = vld [vmem:[#allocation5 + $0x370] ss:$48 sps:$4 sm:$0xff]  }
  0xb6   : > { %2107 = vmatpush1.bf16.msra.mxu1 %v6057_v15  ;;  %2268 = vmatprep.subr.bf16.mxu0 %v6112_v33  ;;  %v6085_v52 = vld [vmem:[#allocation5 + $0x5a4] ss:$48 sps:$4 sm:$0xff]   ;;  %v6087_v54 = vld [vmem:[#allocation5 + $0x5a0] ss:$48 sps:$4 sm:$0xff]   ;;  %v6147_v33 = vld [vmem:[#allocation5 + $0x6c] ss:$48 sps:$4 sm:$0xff]  }
  0xb7   : > { %2108 = vmatprep.subr.bf16.mxu1 %v6058_v16  ;;  %v6142_v53 = vld [vmem:[#allocation5 + $0x3d4] ss:$48 sps:$4 sm:$0xff]   ;;  %v6144_v56 = vld [vmem:[#allocation5 + $0x3d0] ss:$48 sps:$4 sm:$0xff]  }
  0xb8   : > { %v6093_v57 = vld [vmem:[#allocation5 + $0x604] ss:$48 sps:$4 sm:$0xff]   ;;  %v6091_v60 = vld [vmem:[#allocation5 + $0x600] ss:$48 sps:$4 sm:$0xff]  }
  0xb9   : > { %2269 = vmatpush1.bf16.msra.mxu0 %v6114_v35  ;;  %v6148_v58 = vld [vmem:[#allocation5 + $0x434] ss:$48 sps:$4 sm:$0xff]   ;;  %v6150_v62 = vld [vmem:[#allocation5 + $0x430] ss:$48 sps:$4 sm:$0xff]  }
  0xba   : > { %2109 = vmatpush1.bf16.msra.mxu1 %v6060_v20  ;;  %2270 = vmatprep.subr.bf16.mxu0 %v6118_v37  ;;  %v6099_v61 = vld [vmem:[#allocation5 + $0x664] ss:$48 sps:$4 sm:$0xff]   ;;  %v6097_v0 = vld [vmem:[#allocation5 + $0x660] ss:$48 sps:$4 sm:$0xff]   ;;  %v6153_v37 = vld [vmem:[#allocation5 + $0xcc] ss:$48 sps:$4 sm:$0xff]  }
  0xbb   : > { %2110 = vmatprep.subr.bf16.mxu1 %v6061_v24  ;;  %v6154_v63 = vld [vmem:[#allocation5 + $0x494] ss:$48 sps:$4 sm:$0xff]   ;;  %v6156_v3 = vld [vmem:[#allocation5 + $0x490] ss:$48 sps:$4 sm:$0xff]  }
  0xbc   : > { %v6105_v2 = vld [vmem:[#allocation5 + $0x6c4] ss:$48 sps:$4 sm:$0xff]   ;;  %v6103_v5 = vld [vmem:[#allocation5 + $0x6c0] ss:$48 sps:$4 sm:$0xff]  }
  0xbd   : > { %2271 = vmatpush1.bf16.msra.mxu0 %v6120_v39  ;;  %v6160_v4 = vld [vmem:[#allocation5 + $0x4f4] ss:$48 sps:$4 sm:$0xff]   ;;  %v6162_v7 = vld [vmem:[#allocation5 + $0x4f0] ss:$48 sps:$4 sm:$0xff]  }
  0xbe   : > { %2111 = vmatpush1.bf16.msra.mxu1 %v6063_v26  ;;  %2272 = vmatprep.subr.bf16.mxu0 %v6124_v41  ;;  %v6111_v6 = vld [vmem:[#allocation5 + $0x724] ss:$48 sps:$4 sm:$0xff]   ;;  %v6109_v9 = vld [vmem:[#allocation5 + $0x720] ss:$48 sps:$4 sm:$0xff]   ;;  %v6159_v41 = vld [vmem:[#allocation5 + $0x12c] ss:$48 sps:$4 sm:$0xff]  }
  0xbf   : > { %2112 = vmatprep.subr.bf16.mxu1 %v6064_v28  ;;  %v6166_v8 = vld [vmem:[#allocation5 + $0x554] ss:$48 sps:$4 sm:$0xff]   ;;  %v6168_v11 = vld [vmem:[#allocation5 + $0x550] ss:$48 sps:$4 sm:$0xff]   ;;  %v6141_v28 = vld [vmem:[#allocation5 + $0xc] ss:$48 sps:$4 sm:$0xff]  }
  0xc0   : > { %v6117_v10 = vld [vmem:[#allocation5 + $0x784] ss:$48 sps:$4 sm:$0xff]   ;;  %v6115_v13 = vld [vmem:[#allocation5 + $0x780] ss:$48 sps:$4 sm:$0xff]  }
  0xc1   : > { %2273 = vmatpush1.bf16.msra.mxu0 %v6126_v43  ;;  %v6172_v12 = vld [vmem:[#allocation5 + $0x5b4] ss:$48 sps:$4 sm:$0xff]   ;;  %v6174_v15 = vld [vmem:[#allocation5 + $0x5b0] ss:$48 sps:$4 sm:$0xff]  }
  0xc2   : > { %2113 = vmatpush1.bf16.msra.mxu1 %v6066_v30  ;;  %2274 = vmatprep.subr.bf16.mxu0 %v6130_v45  ;;  %v6123_v14 = vld [vmem:[#allocation5 + $0x7e4] ss:$48 sps:$4 sm:$0xff]   ;;  %v6121_v17 = vld [vmem:[#allocation5 + $0x7e0] ss:$48 sps:$4 sm:$0xff]   ;;  %v6165_v45 = vld [vmem:[#allocation5 + $0x18c] ss:$48 sps:$4 sm:$0xff]  }
  0xc3   : > { %2114 = vmatprep.subr.bf16.mxu1 %v6067_v32  ;;  %v6180_v16 = vld [vmem:[#allocation5 + $0x614] ss:$48 sps:$4 sm:$0xff]   ;;  %v6178_v19 = vld [vmem:[#allocation5 + $0x610] ss:$48 sps:$4 sm:$0xff]   ;;  %v6139_v32 = vld [vmem:[#allocation5 + $0x8] ss:$48 sps:$4 sm:$0xff]  }
  0xc4   : > { %v6129_v18 = vld [vmem:[#allocation5 + $0x844] ss:$48 sps:$4 sm:$0xff]   ;;  %v6127_v22 = vld [vmem:[#allocation5 + $0x840] ss:$48 sps:$4 sm:$0xff]  }
  0xc5   : > { %2275 = vmatpush1.bf16.msra.mxu0 %v6132_v47  ;;  %v6186_v20 = vld [vmem:[#allocation5 + $0x674] ss:$48 sps:$4 sm:$0xff]   ;;  %v6184_v24 = vld [vmem:[#allocation5 + $0x670] ss:$48 sps:$4 sm:$0xff]  }
  0xc6   : > { %2115 = vmatpush1.bf16.msra.mxu1 %v6069_v34  ;;  %2276 = vmatprep.subr.bf16.mxu0 %v6136_v49  ;;  %v6135_v23 = vld [vmem:[#allocation5 + $0x8a4] ss:$48 sps:$4 sm:$0xff]   ;;  %v6133_v26 = vld [vmem:[#allocation5 + $0x8a0] ss:$48 sps:$4 sm:$0xff]   ;;  %v6171_v49 = vld [vmem:[#allocation5 + $0x1ec] ss:$48 sps:$4 sm:$0xff]  }
  0xc7   : > { %2116 = vmatprep.subr.bf16.mxu1 %v6070_v36  ;;  %v6192_v25 = vld [vmem:[#allocation5 + $0x6d4] ss:$48 sps:$4 sm:$0xff]   ;;  %v6190_v29 = vld [vmem:[#allocation5 + $0x6d0] ss:$48 sps:$4 sm:$0xff]   ;;  %v6145_v36 = vld [vmem:[#allocation5 + $0x68] ss:$48 sps:$4 sm:$0xff]  }
  0xc8   : > { %v298_v27 = vld [vmem:[%s7325_s8 + $0x10] sm:$0xff] }
  0xc9   : > { %2277 = vmatpush1.bf16.msra.mxu0 %v6138_v51  ;;  %v6198_v30 = vld [vmem:[#allocation5 + $0x734] ss:$48 sps:$4 sm:$0xff]   ;;  %v7352_v31 = vpack.c.bf16 %v298_v27, %v298_v27  ;;  %v6196_v34 = vld [vmem:[#allocation5 + $0x730] ss:$48 sps:$4 sm:$0xff]   ;;  %v6223_v27 = vld [vmem:[#allocation5 + $0x548] ss:$48 sps:$4 sm:$0xff]  }
  0xca   : > { %2117 = vmatpush1.bf16.msra.mxu1 %v6072_v38  ;;  %2278 = vmatprep.subr.bf16.mxu0 %v6142_v53  ;;  %v6204_v35 = vld [vmem:[#allocation5 + $0x794] ss:$48 sps:$4 sm:$0xff]   ;;  %v6202_v38 = vld [vmem:[#allocation5 + $0x790] ss:$48 sps:$4 sm:$0xff]   ;;  %v6177_v53 = vld [vmem:[#allocation5 + $0x24c] ss:$48 sps:$4 sm:$0xff]  }
  0xcb   : > { %2118 = vmatprep.subr.bf16.mxu1 %v6073_v40  ;;  %v6210_v39 = vld [vmem:[#allocation5 + $0x7f4] ss:$48 sps:$4 sm:$0xff]   ;;  %v6151_v40 = vld [vmem:[#allocation5 + $0xc8] ss:$48 sps:$4 sm:$0xff]  }
  0xcc   : > { %v6216_v43 = vld [vmem:[#allocation5 + $0x854] ss:$48 sps:$4 sm:$0xff]  }
  0xcd   : > { %2279 = vmatpush1.bf16.msra.mxu0 %v6144_v56  ;;  %v6222_v47 = vld [vmem:[#allocation5 + $0x8b4] ss:$48 sps:$4 sm:$0xff]   ;;  %v6175_v56 = vld [vmem:[#allocation5 + $0x248] ss:$48 sps:$4 sm:$0xff]  }
  0xce   : > { %2119 = vmatpush1.bf16.msra.mxu1 %v6075_v42  ;;  %2280 = vmatprep.subr.bf16.mxu0 %v6148_v58  ;;  %v6208_v42 = vld [vmem:[#allocation5 + $0x7f0] ss:$48 sps:$4 sm:$0xff]   ;;  %v6228_v51 = vld [vmem:[#allocation5 + $0x24] ss:$48 sps:$4 sm:$0xff]  }
  0xcf   : > { %2120 = vmatprep.subr.bf16.mxu1 %v6076_v44  ;;  %v6157_v44 = vld [vmem:[#allocation5 + $0x128] ss:$48 sps:$4 sm:$0xff]   ;;  %v6234_v55 = vld [vmem:[#allocation5 + $0x84] ss:$48 sps:$4 sm:$0xff]   ;;  %v6232_v58 = vld [vmem:[#allocation5 + $0x80] ss:$48 sps:$4 sm:$0xff]  }
  0xd1   : > { %2281 = vmatpush1.bf16.msra.mxu0 %v6150_v62  ;;  %v6189_v62 = vld [vmem:[#allocation5 + $0x30c] ss:$48 sps:$4 sm:$0xff]  }
  0xd2   : > { %2121 = vmatpush1.bf16.msra.mxu1 %v6078_v46  ;;  %2282 = vmatprep.subr.bf16.mxu0 %v6154_v63  ;;  %v6214_v46 = vld [vmem:[#allocation5 + $0x850] ss:$48 sps:$4 sm:$0xff]  }
  0xd3   : > { %2122 = vmatprep.subr.bf16.mxu1 %v6079_v48  ;;  %v6163_v48 = vld [vmem:[#allocation5 + $0x188] ss:$48 sps:$4 sm:$0xff]   ;;  %v6238_v63 = vld [vmem:[#allocation5 + $0xe0] ss:$48 sps:$4 sm:$0xff]  }
  0xd5   : > { %2283 = vmatpush1.bf16.msra.mxu0 %v6156_v3  ;;  %v6195_v3 = vld [vmem:[#allocation5 + $0x36c] ss:$48 sps:$4 sm:$0xff]  }
  0xd6   : > { %2123 = vmatpush1.bf16.msra.mxu1 %v6081_v50  ;;  %2284 = vmatprep.subr.bf16.mxu0 %v6160_v4  ;;  %v6220_v50 = vld [vmem:[#allocation5 + $0x8b0] ss:$48 sps:$4 sm:$0xff]  }
  0xd7   : > { %2124 = vmatprep.subr.bf16.mxu1 %v6085_v52  ;;  %v6169_v52 = vld [vmem:[#allocation5 + $0x1e8] ss:$48 sps:$4 sm:$0xff]   ;;  %v6244_v4 = vld [vmem:[#allocation5 + $0x140] ss:$48 sps:$4 sm:$0xff]  }
  0xd9   : > { %2285 = vmatpush1.bf16.msra.mxu0 %v6162_v7  ;;  %v6201_v7 = vld [vmem:[#allocation5 + $0x3cc] ss:$48 sps:$4 sm:$0xff]  }
  0xda   : > { %2125 = vmatpush1.bf16.msra.mxu1 %v6087_v54  ;;  %2286 = vmatprep.subr.bf16.mxu0 %v6166_v8  ;;  %v6226_v54 = vld [vmem:[#allocation5 + $0x20] ss:$48 sps:$4 sm:$0xff]  }
  0xdb   : > { %2135 = vmatprep.subr.bf16.mxu1 %v6093_v57  ;;  %v6183_v57 = vld [vmem:[#allocation5 + $0x2ac] ss:$48 sps:$4 sm:$0xff]   ;;  %v6250_v8 = vld [vmem:[#allocation5 + $0x1a0] ss:$48 sps:$4 sm:$0xff]  }
  0xdd   : > { %2127 = vmatmul.mubr.bf16.vlgmr.msra.gmra.mrb[0].mxu1 %v7345_v59  ;;  %2287 = vmatpush1.bf16.msra.mxu0 %v6168_v11  ;;  %v6207_v11 = vld [vmem:[#allocation5 + $0x42c] ss:$48 sps:$4 sm:$0xff]  }
  0xde   : > { %2136 = vmatpush1.bf16.msra.mxu1 %v6091_v60  ;;  %2167 = vmatprep.mubr.bf16.mxu1 %v7081_v1  ;;  %v6240_v60 = vld [vmem:[#allocation5 + $0xe4] ss:$48 sps:$4 sm:$0xff]  }
  0xdf   : > { %2137 = vmatprep.subr.bf16.mxu1 %v6099_v61  ;;  %2288 = vmatprep.subr.bf16.mxu0 %v6172_v12  ;;  %v6181_v61 = vld [vmem:[#allocation5 + $0x2a8] ss:$48 sps:$4 sm:$0xff]   ;;  %v6256_v12 = vld [vmem:[#allocation5 + $0x200] ss:$48 sps:$4 sm:$0xff]  }
  0xe1   : > { %2289 = vmatpush1.bf16.msra.mxu0 %v6174_v15  ;;  %v6213_v15 = vld [vmem:[#allocation5 + $0x48c] ss:$48 sps:$4 sm:$0xff]  }
  0xe2   : > { %2138 = vmatpush1.bf16.msra.mxu1 %v6097_v0  ;;  %2299 = vmatprep.subr.bf16.mxu0 %v6180_v16  ;;  %v6246_v0 = vld [vmem:[#allocation5 + $0x144] ss:$48 sps:$4 sm:$0xff]   ;;  %v6262_v16 = vld [vmem:[#allocation5 + $0x260] ss:$48 sps:$4 sm:$0xff]  }
  0xe3   : > { %2139 = vmatprep.subr.bf16.mxu1 %v6105_v2  ;;  %v6187_v2 = vld [vmem:[#allocation5 + $0x308] ss:$48 sps:$4 sm:$0xff]  }
  0xe4   : > { %2291 = vmatmul.mubr.bf16.vlgmr.msra.gmra.mrb[0].mxu0 %v7345_v59 }
  0xe5   : > { %2300 = vmatpush1.bf16.msra.mxu0 %v6178_v19  ;;  %2331 = vmatprep.mubr.bf16.mxu0 %v7081_v1  ;;  %v6219_v19 = vld [vmem:[#allocation5 + $0x4ec] ss:$48 sps:$4 sm:$0xff]  }
  0xe6   : > { %2140 = vmatpush1.bf16.msra.mxu1 %v6103_v5  ;;  %2301 = vmatprep.subr.bf16.mxu0 %v6186_v20  ;;  %v6252_v5 = vld [vmem:[#allocation5 + $0x1a4] ss:$48 sps:$4 sm:$0xff]   ;;  %v6268_v20 = vld [vmem:[#allocation5 + $0x2c0] ss:$48 sps:$4 sm:$0xff]  }
  0xe7   : > { %2141 = vmatprep.subr.bf16.mxu1 %v6111_v6  ;;  %v6193_v6 = vld [vmem:[#allocation5 + $0x368] ss:$48 sps:$4 sm:$0xff]  }
  0xe9   : > { %2302 = vmatpush1.bf16.msra.mxu0 %v6184_v24  ;;  %v6225_v24 = vld [vmem:[#allocation5 + $0x54c] ss:$48 sps:$4 sm:$0xff]  }
  0xea   : > { %2142 = vmatpush1.bf16.msra.mxu1 %v6109_v9  ;;  %2303 = vmatprep.subr.bf16.mxu0 %v6192_v25  ;;  %v6258_v9 = vld [vmem:[#allocation5 + $0x204] ss:$48 sps:$4 sm:$0xff]   ;;  %v6274_v25 = vld [vmem:[#allocation5 + $0x320] ss:$48 sps:$4 sm:$0xff]  }
  0xeb   : > { %2143 = vmatprep.subr.bf16.mxu1 %v6117_v10  ;;  %v6199_v10 = vld [vmem:[#allocation5 + $0x3c8] ss:$48 sps:$4 sm:$0xff]  }
  0xed   : > { %2304 = vmatpush1.bf16.msra.mxu0 %v6190_v29  ;;  %v6280_v29 = vld [vmem:[#allocation5 + $0x380] ss:$48 sps:$4 sm:$0xff]  }
  0xee   : > { %2144 = vmatpush1.bf16.msra.mxu1 %v6115_v13  ;;  %2305 = vmatprep.subr.bf16.mxu0 %v6198_v30  ;;  %v6264_v13 = vld [vmem:[#allocation5 + $0x264] ss:$48 sps:$4 sm:$0xff]  }
  0xef   : > { %2145 = vmatprep.subr.bf16.mxu1 %v6123_v14  ;;  %v6205_v14 = vld [vmem:[#allocation5 + $0x428] ss:$48 sps:$4 sm:$0xff]   ;;  %v6288_v30 = vld [vmem:[#allocation5 + $0x3e4] ss:$48 sps:$4 sm:$0xff]  }
  0xf1   : > { %2306 = vmatpush1.bf16.msra.mxu0 %v6196_v34  ;;  %v6286_v34 = vld [vmem:[#allocation5 + $0x3e0] ss:$48 sps:$4 sm:$0xff]  }
  0xf2   : > { %2146 = vmatpush1.bf16.msra.mxu1 %v6121_v17  ;;  %2307 = vmatprep.subr.bf16.mxu0 %v6204_v35  ;;  %v6270_v17 = vld [vmem:[#allocation5 + $0x2c4] ss:$48 sps:$4 sm:$0xff]  }
  0xf3   : > { %2147 = vmatprep.subr.bf16.mxu1 %v6129_v18  ;;  %v6211_v18 = vld [vmem:[#allocation5 + $0x488] ss:$48 sps:$4 sm:$0xff]   ;;  %v6294_v35 = vld [vmem:[#allocation5 + $0x444] ss:$48 sps:$4 sm:$0xff]  }
  0xf5   : > { %2308 = vmatpush1.bf16.msra.mxu0 %v6202_v38  ;;  %v6292_v38 = vld [vmem:[#allocation5 + $0x440] ss:$48 sps:$4 sm:$0xff]  }
  0xf6   : > { %2148 = vmatpush1.bf16.msra.mxu1 %v6127_v22  ;;  %2309 = vmatprep.subr.bf16.mxu0 %v6210_v39  ;;  %v6276_v22 = vld [vmem:[#allocation5 + $0x324] ss:$48 sps:$4 sm:$0xff]  }
  0xf7   : > { %2149 = vmatprep.subr.bf16.mxu1 %v6135_v23  ;;  %v6217_v23 = vld [vmem:[#allocation5 + $0x4e8] ss:$48 sps:$4 sm:$0xff]   ;;  %v6300_v39 = vld [vmem:[#allocation5 + $0x4a4] ss:$48 sps:$4 sm:$0xff]  }
  0xf9   : > { %2310 = vmatpush1.bf16.msra.mxu0 %v6208_v42  ;;  %v6298_v42 = vld [vmem:[#allocation5 + $0x4a0] ss:$48 sps:$4 sm:$0xff]  }
  0xfa   : > { %2150 = vmatpush1.bf16.msra.mxu1 %v6133_v26  ;;  %2311 = vmatprep.subr.bf16.mxu0 %v6216_v43  ;;  %v6282_v26 = vld [vmem:[#allocation5 + $0x384] ss:$48 sps:$4 sm:$0xff]  }
  0xfb   : > { %2176 = vmatprep.subr.bf16.mxu1 %v6141_v28  ;;  %v6231_v28 = vld [vmem:[#allocation5 + $0x5ac] ss:$48 sps:$4 sm:$0xff]   ;;  %v6306_v43 = vld [vmem:[#allocation5 + $0x504] ss:$48 sps:$4 sm:$0xff]  }
  0xfd   : > { %2168 = vmatmul.mubr.bf16.vlgmr.msra.gmra.mrb[0].mxu1 %v7352_v31  ;;  %2312 = vmatpush1.bf16.msra.mxu0 %v6214_v46  ;;  %v6304_v46 = vld [vmem:[#allocation5 + $0x500] ss:$48 sps:$4 sm:$0xff]  }
  0xfe   : > { %2177 = vmatpush1.bf16.msra.mxu1 %v6139_v32  ;;  %2208 = vmatprep.mubr.bf16.mxu1 %v7340_v21  ;;  %v6229_v32 = vld [vmem:[#allocation5 + $0x5a8] ss:$48 sps:$4 sm:$0xff]  }
  0xff   : > { %2178 = vmatprep.subr.bf16.mxu1 %v6147_v33  ;;  %2313 = vmatprep.subr.bf16.mxu0 %v6222_v47  ;;  %v6237_v33 = vld [vmem:[#allocation5 + $0x60c] ss:$48 sps:$4 sm:$0xff]   ;;  %v6312_v47 = vld [vmem:[#allocation5 + $0x564] ss:$48 sps:$4 sm:$0xff]  }
 0x101   : > { %2314 = vmatpush1.bf16.msra.mxu0 %v6220_v50  ;;  %v6310_v50 = vld [vmem:[#allocation5 + $0x560] ss:$48 sps:$4 sm:$0xff]  }
 0x102   : > { %2179 = vmatpush1.bf16.msra.mxu1 %v6145_v36  ;;  %2422 = vmatprep.subr.bf16.mxu0 %v6228_v51  ;;  %v6235_v36 = vld [vmem:[#allocation5 + $0x608] ss:$48 sps:$4 sm:$0xff]   ;;  %v6318_v51 = vld [vmem:[#allocation5 + $0x5c4] ss:$48 sps:$4 sm:$0xff]  }
 0x103   : > { %2180 = vmatprep.subr.bf16.mxu1 %v6153_v37  ;;  %v6243_v37 = vld [vmem:[#allocation5 + $0x66c] ss:$48 sps:$4 sm:$0xff]  }
 0x104   : > { %2332 = vmatmul.mubr.bf16.vlgmr.msra.gmra.mrb[0].mxu0 %v7352_v31 }
 0x105   : > { %2423 = vmatpush1.bf16.msra.mxu0 %v6226_v54  ;;  %2454 = vmatprep.mubr.bf16.mxu0 %v7340_v21  ;;  %v6316_v54 = vld [vmem:[#allocation5 + $0x5c0] ss:$48 sps:$4 sm:$0xff]  }
 0x106   : > { %2181 = vmatpush1.bf16.msra.mxu1 %v6151_v40  ;;  %2424 = vmatprep.subr.bf16.mxu0 %v6234_v55  ;;  %v6241_v40 = vld [vmem:[#allocation5 + $0x668] ss:$48 sps:$4 sm:$0xff]   ;;  %v6324_v55 = vld [vmem:[#allocation5 + $0x624] ss:$48 sps:$4 sm:$0xff]  }
 0x107   : > { %2182 = vmatprep.subr.bf16.mxu1 %v6159_v41  ;;  %v6249_v41 = vld [vmem:[#allocation5 + $0x6cc] ss:$48 sps:$4 sm:$0xff]  }
 0x109   : > { %2425 = vmatpush1.bf16.msra.mxu0 %v6232_v58  ;;  %v6322_v58 = vld [vmem:[#allocation5 + $0x620] ss:$48 sps:$4 sm:$0xff]  }
 0x10a   : > { %2183 = vmatpush1.bf16.msra.mxu1 %v6157_v44  ;;  %2426 = vmatprep.subr.bf16.mxu0 %v6240_v60  ;;  %v6247_v44 = vld [vmem:[#allocation5 + $0x6c8] ss:$48 sps:$4 sm:$0xff]   ;;  %v6330_v60 = vld [vmem:[#allocation5 + $0x684] ss:$48 sps:$4 sm:$0xff]  }
 0x10b   : > { %2184 = vmatprep.subr.bf16.mxu1 %v6165_v45  ;;  %v6255_v45 = vld [vmem:[#allocation5 + $0x72c] ss:$48 sps:$4 sm:$0xff]  }
 0x10d   : > { %2427 = vmatpush1.bf16.msra.mxu0 %v6238_v63  ;;  %v6328_v63 = vld [vmem:[#allocation5 + $0x680] ss:$48 sps:$4 sm:$0xff]  }
 0x10e   : > { %2185 = vmatpush1.bf16.msra.mxu1 %v6163_v48  ;;  %2428 = vmatprep.subr.bf16.mxu0 %v6246_v0  ;;  %v6253_v48 = vld [vmem:[#allocation5 + $0x728] ss:$48 sps:$4 sm:$0xff]   ;;  %v6336_v0 = vld [vmem:[#allocation5 + $0x6e4] ss:$48 sps:$4 sm:$0xff]  }
 0x10f   : > { %2186 = vmatprep.subr.bf16.mxu1 %v6171_v49  ;;  %v6261_v49 = vld [vmem:[#allocation5 + $0x78c] ss:$48 sps:$4 sm:$0xff]  }
 0x111   : > { %2429 = vmatpush1.bf16.msra.mxu0 %v6244_v4  ;;  %v6334_v4 = vld [vmem:[#allocation5 + $0x6e0] ss:$48 sps:$4 sm:$0xff]  }
 0x112   : > { %2187 = vmatpush1.bf16.msra.mxu1 %v6169_v52  ;;  %2430 = vmatprep.subr.bf16.mxu0 %v6252_v5  ;;  %v6259_v52 = vld [vmem:[#allocation5 + $0x788] ss:$48 sps:$4 sm:$0xff]   ;;  %v6342_v5 = vld [vmem:[#allocation5 + $0x744] ss:$48 sps:$4 sm:$0xff]  }
 0x113   : > { %2188 = vmatprep.subr.bf16.mxu1 %v6177_v53  ;;  %v6267_v53 = vld [vmem:[#allocation5 + $0x7ec] ss:$48 sps:$4 sm:$0xff]  }
 0x115   : > { %2431 = vmatpush1.bf16.msra.mxu0 %v6250_v8  ;;  %v6340_v8 = vld [vmem:[#allocation5 + $0x740] ss:$48 sps:$4 sm:$0xff]  }
 0x116   : > { %2189 = vmatpush1.bf16.msra.mxu1 %v6175_v56  ;;  %2432 = vmatprep.subr.bf16.mxu0 %v6258_v9  ;;  %v6265_v56 = vld [vmem:[#allocation5 + $0x7e8] ss:$48 sps:$4 sm:$0xff]   ;;  %v6348_v9 = vld [vmem:[#allocation5 + $0x7a4] ss:$48 sps:$4 sm:$0xff]  }
 0x117   : > { %2190 = vmatprep.subr.bf16.mxu1 %v6183_v57  ;;  %v6273_v57 = vld [vmem:[#allocation5 + $0x84c] ss:$48 sps:$4 sm:$0xff]  }
 0x119   : > { %2433 = vmatpush1.bf16.msra.mxu0 %v6256_v12  ;;  %v6346_v12 = vld [vmem:[#allocation5 + $0x7a0] ss:$48 sps:$4 sm:$0xff]  }
 0x11a   : > { %2191 = vmatpush1.bf16.msra.mxu1 %v6181_v61  ;;  %2434 = vmatprep.subr.bf16.mxu0 %v6264_v13  ;;  %v6271_v61 = vld [vmem:[#allocation5 + $0x848] ss:$48 sps:$4 sm:$0xff]   ;;  %v6354_v13 = vld [vmem:[#allocation5 + $0x804] ss:$48 sps:$4 sm:$0xff]  }
 0x11b   : > { %2192 = vmatprep.subr.bf16.mxu1 %v6189_v62  ;;  %v6279_v62 = vld [vmem:[#allocation5 + $0x8ac] ss:$48 sps:$4 sm:$0xff]  }
 0x11d   : > { %2435 = vmatpush1.bf16.msra.mxu0 %v6262_v16  ;;  %v6352_v16 = vld [vmem:[#allocation5 + $0x800] ss:$48 sps:$4 sm:$0xff]  }
 0x11e   : > { %2193 = vmatpush1.bf16.msra.mxu1 %v6187_v2  ;;  %2436 = vmatprep.subr.bf16.mxu0 %v6270_v17  ;;  %v6277_v2 = vld [vmem:[#allocation5 + $0x8a8] ss:$48 sps:$4 sm:$0xff]   ;;  %v6360_v17 = vld [vmem:[#allocation5 + $0x864] ss:$48 sps:$4 sm:$0xff]  }
 0x11f   : > { %2194 = vmatprep.subr.bf16.mxu1 %v6195_v3  ;;  %v6285_v3 = vld [vmem:[#allocation5 + $0x1c] ss:$48 sps:$4 sm:$0xff]  }
 0x121   : > { %2437 = vmatpush1.bf16.msra.mxu0 %v6268_v20  ;;  %v6358_v20 = vld [vmem:[#allocation5 + $0x860] ss:$48 sps:$4 sm:$0xff]  }
 0x122   : > { %2195 = vmatpush1.bf16.msra.mxu1 %v6193_v6  ;;  %2438 = vmatprep.subr.bf16.mxu0 %v6276_v22  ;;  %v6283_v6 = vld [vmem:[#allocation5 + $0x18] ss:$48 sps:$4 sm:$0xff]   ;;  %v6366_v22 = vld [vmem:[#allocation5 + $0x8c4] ss:$48 sps:$4 sm:$0xff]  }
 0x123   : > { %2196 = vmatprep.subr.bf16.mxu1 %v6201_v7  ;;  %v6291_v7 = vld [vmem:[#allocation5 + $0x7c] ss:$48 sps:$4 sm:$0xff]  }
 0x125   : > { %2439 = vmatpush1.bf16.msra.mxu0 %v6274_v25  ;;  %v6364_v25 = vld [vmem:[#allocation5 + $0x8c0] ss:$48 sps:$4 sm:$0xff]  }
 0x126   : > { %2197 = vmatpush1.bf16.msra.mxu1 %v6199_v10  ;;  %2440 = vmatprep.subr.bf16.mxu0 %v6282_v26  ;;  %v6289_v10 = vld [vmem:[#allocation5 + $0x78] ss:$48 sps:$4 sm:$0xff]   ;;  %v6375_v26 = vld [vmem:[#allocation8 + $0x4] ss:$12 sps:$4 sm:$0xff]  }
 0x127   : > { %2198 = vmatprep.subr.bf16.mxu1 %v6207_v11  ;;  %v6297_v11 = vld [vmem:[#allocation5 + $0xdc] ss:$48 sps:$4 sm:$0xff]  }
 0x129   : > { %2441 = vmatpush1.bf16.msra.mxu0 %v6280_v29  ;;  %v6373_v29 = vld [vmem:[#allocation8] ss:$12 sps:$4 sm:$0xff]  }
 0x12a   : > { %2199 = vmatpush1.bf16.msra.mxu1 %v6205_v14  ;;  %2442 = vmatprep.subr.bf16.mxu0 %v6288_v30  ;;  %v6295_v14 = vld [vmem:[#allocation5 + $0xd8] ss:$48 sps:$4 sm:$0xff]  }
 0x12b   : > { %2200 = vmatprep.subr.bf16.mxu1 %v6213_v15  ;;  %v6303_v15 = vld [vmem:[#allocation5 + $0x13c] ss:$48 sps:$4 sm:$0xff]   ;;  %v6381_v30 = vld [vmem:[#allocation8 + $0x1c] ss:$12 sps:$4 sm:$0xff]  }
 0x12d   : > { %2443 = vmatpush1.bf16.msra.mxu0 %v6286_v34  ;;  %v6379_v34 = vld [vmem:[#allocation8 + $0x18] ss:$12 sps:$4 sm:$0xff]  }
 0x12e   : > { %2201 = vmatpush1.bf16.msra.mxu1 %v6211_v18  ;;  %2444 = vmatprep.subr.bf16.mxu0 %v6294_v35  ;;  %v6301_v18 = vld [vmem:[#allocation5 + $0x138] ss:$48 sps:$4 sm:$0xff]   ;;  %v6387_v35 = vld [vmem:[#allocation8 + $0x34] ss:$12 sps:$4 sm:$0xff]  }
 0x12f   : > { %2202 = vmatprep.subr.bf16.mxu1 %v6219_v19  ;;  %v6309_v19 = vld [vmem:[#allocation5 + $0x19c] ss:$48 sps:$4 sm:$0xff]  }
 0x131   : > { %2445 = vmatpush1.bf16.msra.mxu0 %v6292_v38  ;;  %v6385_v38 = vld [vmem:[#allocation8 + $0x30] ss:$12 sps:$4 sm:$0xff]  }
 0x132   : > { %2203 = vmatpush1.bf16.msra.mxu1 %v6217_v23  ;;  %2446 = vmatprep.subr.bf16.mxu0 %v6300_v39  ;;  %v6307_v23 = vld [vmem:[#allocation5 + $0x198] ss:$48 sps:$4 sm:$0xff]  }
 0x133   : > { %2204 = vmatprep.subr.bf16.mxu1 %v6225_v24  ;;  %v6315_v24 = vld [vmem:[#allocation5 + $0x1fc] ss:$48 sps:$4 sm:$0xff]   ;;  %v6393_v39 = vld [vmem:[#allocation8 + $0x4c] ss:$12 sps:$4 sm:$0xff]  }
 0x135   : > { %2447 = vmatpush1.bf16.msra.mxu0 %v6298_v42  ;;  %v6391_v42 = vld [vmem:[#allocation8 + $0x48] ss:$12 sps:$4 sm:$0xff]  }
 0x136   : > { %2205 = vmatpush1.bf16.msra.mxu1 %v6223_v27  ;;  %2448 = vmatprep.subr.bf16.mxu0 %v6306_v43  ;;  %v6313_v27 = vld [vmem:[#allocation5 + $0x1f8] ss:$48 sps:$4 sm:$0xff]   ;;  %v6399_v43 = vld [vmem:[#allocation8 + $0x64] ss:$12 sps:$4 sm:$0xff]  }
 0x137   : > { %2206 = vmatprep.subr.bf16.mxu1 %v6231_v28  ;;  %v6321_v28 = vld [vmem:[#allocation5 + $0x25c] ss:$48 sps:$4 sm:$0xff]  }
 0x139   : > { %2449 = vmatpush1.bf16.msra.mxu0 %v6304_v46  ;;  %v6397_v46 = vld [vmem:[#allocation8 + $0x60] ss:$12 sps:$4 sm:$0xff]  }
 0x13a   : > { %2207 = vmatpush1.bf16.msra.mxu1 %v6229_v32  ;;  %2450 = vmatprep.subr.bf16.mxu0 %v6312_v47  ;;  %v6319_v32 = vld [vmem:[#allocation5 + $0x258] ss:$48 sps:$4 sm:$0xff]  }
 0x13b   : > { %2217 = vmatprep.subr.bf16.mxu1 %v6237_v33  ;;  %v6327_v33 = vld [vmem:[#allocation5 + $0x2bc] ss:$48 sps:$4 sm:$0xff]   ;;  %v6405_v47 = vld [vmem:[#allocation8 + $0x7c] ss:$12 sps:$4 sm:$0xff]  }
 0x13d   : > { %2209 = vmatmul.mubr.bf16.vlgmr.msra.gmra.mrb[4].mxu1 %v7345_v59  ;;  %2451 = vmatpush1.bf16.msra.mxu0 %v6310_v50  ;;  %v6403_v50 = vld [vmem:[#allocation8 + $0x78] ss:$12 sps:$4 sm:$0xff]  }
 0x13e   : > { %2218 = vmatpush1.bf16.msra.mxu1 %v6235_v36  ;;  %2249 = vmatprep.mubr.bf16.mxu1 %v7081_v1  ;;  %v6325_v36 = vld [vmem:[#allocation5 + $0x2b8] ss:$48 sps:$4 sm:$0xff]  }
 0x13f   : > { %2219 = vmatprep.subr.bf16.mxu1 %v6243_v37  ;;  %2452 = vmatprep.subr.bf16.mxu0 %v6318_v51  ;;  %v6333_v37 = vld [vmem:[#allocation5 + $0x31c] ss:$48 sps:$4 sm:$0xff]  }
 0x140   : > { %v6411_v51 = vld [vmem:[#allocation8 + $0x94] ss:$12 sps:$4 sm:$0xff]  }
 0x141   : > { %2453 = vmatpush1.bf16.msra.mxu0 %v6316_v54  ;;  %v6409_v54 = vld [vmem:[#allocation8 + $0x90] ss:$12 sps:$4 sm:$0xff]  }
 0x142   : > { %2220 = vmatpush1.bf16.msra.mxu1 %v6241_v40  ;;  %2463 = vmatprep.subr.bf16.mxu0 %v6324_v55  ;;  %v6331_v40 = vld [vmem:[#allocation5 + $0x318] ss:$48 sps:$4 sm:$0xff]  }
 0x143   : > { %2221 = vmatprep.subr.bf16.mxu1 %v6249_v41  ;;  %v6339_v41 = vld [vmem:[#allocation5 + $0x37c] ss:$48 sps:$4 sm:$0xff]   ;;  %v6417_v55 = vld [vmem:[#allocation8 + $0xac] ss:$12 sps:$4 sm:$0xff]  }
 0x144   : > { %2455 = vmatmul.mubr.bf16.vlgmr.msra.gmra.mrb[4].mxu0 %v7345_v59 }
 0x145   : > { %2464 = vmatpush1.bf16.msra.mxu0 %v6322_v58  ;;  %2495 = vmatprep.mubr.bf16.mxu0 %v7081_v1  ;;  %v6415_v58 = vld [vmem:[#allocation8 + $0xa8] ss:$12 sps:$4 sm:$0xff]  }
 0x146   : > { %2222 = vmatpush1.bf16.msra.mxu1 %v6247_v44  ;;  %2465 = vmatprep.subr.bf16.mxu0 %v6330_v60  ;;  %v6337_v44 = vld [vmem:[#allocation5 + $0x378] ss:$48 sps:$4 sm:$0xff]   ;;  %v6423_v60 = vld [vmem:[#allocation8 + $0xc4] ss:$12 sps:$4 sm:$0xff]  }
 0x147   : > { %2223 = vmatprep.subr.bf16.mxu1 %v6255_v45  ;;  %v6345_v45 = vld [vmem:[#allocation5 + $0x3dc] ss:$48 sps:$4 sm:$0xff]  }
 0x149   : > { %2466 = vmatpush1.bf16.msra.mxu0 %v6328_v63  ;;  %v6421_v63 = vld [vmem:[#allocation8 + $0xc0] ss:$12 sps:$4 sm:$0xff]  }
 0x14a   : > { %2224 = vmatpush1.bf16.msra.mxu1 %v6253_v48  ;;  %2467 = vmatprep.subr.bf16.mxu0 %v6336_v0  ;;  %v6343_v48 = vld [vmem:[#allocation5 + $0x3d8] ss:$48 sps:$4 sm:$0xff]  }
 0x14b   : > { %2225 = vmatprep.subr.bf16.mxu1 %v6261_v49  ;;  %v6351_v49 = vld [vmem:[#allocation5 + $0x43c] ss:$48 sps:$4 sm:$0xff]   ;;  %v6429_v0 = vld [vmem:[#allocation8 + $0xdc] ss:$12 sps:$4 sm:$0xff]  }
 0x14d   : > { %2468 = vmatpush1.bf16.msra.mxu0 %v6334_v4  ;;  %v6427_v4 = vld [vmem:[#allocation8 + $0xd8] ss:$12 sps:$4 sm:$0xff]  }
 0x14e   : > { %2226 = vmatpush1.bf16.msra.mxu1 %v6259_v52  ;;  %2469 = vmatprep.subr.bf16.mxu0 %v6342_v5  ;;  %v6349_v52 = vld [vmem:[#allocation5 + $0x438] ss:$48 sps:$4 sm:$0xff]   ;;  %v6435_v5 = vld [vmem:[#allocation8 + $0xf4] ss:$12 sps:$4 sm:$0xff]  }
 0x14f   : > { %2227 = vmatprep.subr.bf16.mxu1 %v6267_v53  ;;  %v6357_v53 = vld [vmem:[#allocation5 + $0x49c] ss:$48 sps:$4 sm:$0xff]  }
 0x151   : > { %2470 = vmatpush1.bf16.msra.mxu0 %v6340_v8  ;;  %v6433_v8 = vld [vmem:[#allocation8 + $0xf0] ss:$12 sps:$4 sm:$0xff]  }
 0x152   : > { %2228 = vmatpush1.bf16.msra.mxu1 %v6265_v56  ;;  %2471 = vmatprep.subr.bf16.mxu0 %v6348_v9  ;;  %v6355_v56 = vld [vmem:[#allocation5 + $0x498] ss:$48 sps:$4 sm:$0xff]  }
 0x153   : > { %2229 = vmatprep.subr.bf16.mxu1 %v6273_v57  ;;  %v6363_v57 = vld [vmem:[#allocation5 + $0x4fc] ss:$48 sps:$4 sm:$0xff]   ;;  %v6441_v9 = vld [vmem:[#allocation8 + $0x10c] ss:$12 sps:$4 sm:$0xff]  }
 0x155   : > { %2472 = vmatpush1.bf16.msra.mxu0 %v6346_v12  ;;  %v6439_v12 = vld [vmem:[#allocation8 + $0x108] ss:$12 sps:$4 sm:$0xff]  }
 0x156   : > { %2230 = vmatpush1.bf16.msra.mxu1 %v6271_v61  ;;  %2473 = vmatprep.subr.bf16.mxu0 %v6354_v13  ;;  %v6361_v61 = vld [vmem:[#allocation5 + $0x4f8] ss:$48 sps:$4 sm:$0xff]   ;;  %v6447_v13 = vld [vmem:[#allocation8 + $0x124] ss:$12 sps:$4 sm:$0xff]  }
 0x157   : > { %2231 = vmatprep.subr.bf16.mxu1 %v6279_v62  ;;  %v6369_v62 = vld [vmem:[#allocation5 + $0x55c] ss:$48 sps:$4 sm:$0xff]  }
 0x159   : > { %2474 = vmatpush1.bf16.msra.mxu0 %v6352_v16  ;;  %v6445_v16 = vld [vmem:[#allocation8 + $0x120] ss:$12 sps:$4 sm:$0xff]  }
 0x15a   : > { %2232 = vmatpush1.bf16.msra.mxu1 %v6277_v2  ;;  %2475 = vmatprep.subr.bf16.mxu0 %v6360_v17  ;;  %v6367_v2 = vld [vmem:[#allocation5 + $0x558] ss:$48 sps:$4 sm:$0xff]  }
 0x15b   : > { %2340 = vmatprep.subr.bf16.mxu1 %v6285_v3  ;;  %v6372_v3 = vld [vmem:[#allocation5 + $0x5bc] ss:$48 sps:$4 sm:$0xff]   ;;  %v6453_v17 = vld [vmem:[#allocation8 + $0x13c] ss:$12 sps:$4 sm:$0xff]  }
 0x15d   : > { %2250 = vmatmul.mubr.bf16.vlgmr.msra.gmra.mrb[4].mxu1 %v7352_v31  ;;  %2476 = vmatpush1.bf16.msra.mxu0 %v6358_v20  ;;  %v6451_v20 = vld [vmem:[#allocation8 + $0x138] ss:$12 sps:$4 sm:$0xff]  }
 0x15e   : > { %2341 = vmatpush1.bf16.msra.mxu1 %v6283_v6  ;;  %2372 = vmatprep.mubr.bf16.mxu1 %v7340_v21  ;;  %v6370_v6 = vld [vmem:[#allocation5 + $0x5b8] ss:$48 sps:$4 sm:$0xff]  }
 0x15f   : > { %2342 = vmatprep.subr.bf16.mxu1 %v6291_v7  ;;  %2477 = vmatprep.subr.bf16.mxu0 %v6366_v22  ;;  %v6378_v7 = vld [vmem:[#allocation5 + $0x61c] ss:$48 sps:$4 sm:$0xff]  }
 0x160   : > { %v6459_v22 = vld [vmem:[#allocation8 + $0x154] ss:$12 sps:$4 sm:$0xff]  }
 0x161   : > { %2478 = vmatpush1.bf16.msra.mxu0 %v6364_v25  ;;  %v6457_v25 = vld [vmem:[#allocation8 + $0x150] ss:$12 sps:$4 sm:$0xff]  }
 0x162   : > { %2343 = vmatpush1.bf16.msra.mxu1 %v6289_v10  ;;  %4547 = vmatprep.subr.bf16.mxu0 %v6375_v26  ;;  %v6376_v10 = vld [vmem:[#allocation5 + $0x618] ss:$48 sps:$4 sm:$0xff]  }
 0x163   : > { %2344 = vmatprep.subr.bf16.mxu1 %v6297_v11  ;;  %v6384_v11 = vld [vmem:[#allocation5 + $0x67c] ss:$48 sps:$4 sm:$0xff]   ;;  %v6465_v26 = vld [vmem:[#allocation8 + $0x16c] ss:$12 sps:$4 sm:$0xff]  }
 0x164   : > { %2496 = vmatmul.mubr.bf16.vlgmr.msra.gmra.mrb[4].mxu0 %v7352_v31 }
 0x165   : > { %4548 = vmatpush1.bf16.msra.mxu0 %v6373_v29  ;;  %v6463_v29 = vld [vmem:[#allocation8 + $0x168] ss:$12 sps:$4 sm:$0xff]  }
 0x166   : > { %2345 = vmatpush1.bf16.msra.mxu1 %v6295_v14  ;;  %4549 = vmatprep.subr.bf16.mxu0 %v6381_v30  ;;  %v6382_v14 = vld [vmem:[#allocation5 + $0x678] ss:$48 sps:$4 sm:$0xff]   ;;  %v6492_v30 = vld [vmem:[#allocation8 + $0x184] ss:$12 sps:$4 sm:$0xff]  }
 0x167   : > { %2346 = vmatprep.subr.bf16.mxu1 %v6303_v15  ;;  %v6390_v15 = vld [vmem:[#allocation5 + $0x6dc] ss:$48 sps:$4 sm:$0xff]  }
 0x169   : > { %4550 = vmatpush1.bf16.msra.mxu0 %v6379_v34  ;;  %v6412_v34 = vld [vmem:[#allocation5 + $0x858] ss:$48 sps:$4 sm:$0xff]  }
 0x16a   : > { %2347 = vmatpush1.bf16.msra.mxu1 %v6301_v18  ;;  %4551 = vmatprep.subr.bf16.mxu0 %v6387_v35  ;;  %v6388_v18 = vld [vmem:[#allocation5 + $0x6d8] ss:$48 sps:$4 sm:$0xff]   ;;  %v6420_v35 = vld [vmem:[#allocation5 + $0x8bc] ss:$48 sps:$4 sm:$0xff]  }
 0x16b   : > { %2348 = vmatprep.subr.bf16.mxu1 %v6309_v19  ;;  %v6396_v19 = vld [vmem:[#allocation5 + $0x73c] ss:$48 sps:$4 sm:$0xff]  }
 0x16d   : > { %4552 = vmatpush1.bf16.msra.mxu0 %v6385_v38  ;;  %v6424_v38 = vld [vmem:[#allocation5 + $0x28] ss:$48 sps:$4 sm:$0xff]  }
 0x16e   : > { %2349 = vmatpush1.bf16.msra.mxu1 %v6307_v23  ;;  %4553 = vmatprep.subr.bf16.mxu0 %v6393_v39  ;;  %v6394_v23 = vld [vmem:[#allocation5 + $0x738] ss:$48 sps:$4 sm:$0xff]   ;;  %v6432_v39 = vld [vmem:[#allocation5 + $0x8c] ss:$48 sps:$4 sm:$0xff]  }
 0x16f   : > { %2350 = vmatprep.subr.bf16.mxu1 %v6315_v24  ;;  %v6402_v24 = vld [vmem:[#allocation5 + $0x79c] ss:$48 sps:$4 sm:$0xff]  }
 0x171   : > { %4554 = vmatpush1.bf16.msra.mxu0 %v6391_v42  ;;  %v594_v42 = vlaneseq }
 0x172   : > { %2351 = vmatpush1.bf16.msra.mxu1 %v6313_v27  ;;  %4555 = vmatprep.subr.bf16.mxu0 %v6399_v43  ;;  %v6400_v27 = vld [vmem:[#allocation5 + $0x798] ss:$48 sps:$4 sm:$0xff]  }
 0x173   : > { %2352 = vmatprep.subr.bf16.mxu1 %v6321_v28  ;;  %v6408_v28 = vld [vmem:[#allocation5 + $0x7fc] ss:$48 sps:$4 sm:$0xff]   ;;  %v6436_v43 = vld [vmem:[#allocation5 + $0xe8] ss:$48 sps:$4 sm:$0xff]  }
 0x175   : > { %4556 = vmatpush1.bf16.msra.mxu0 %v6397_v46  ;;  %v6442_v46 = vld [vmem:[#allocation5 + $0x148] ss:$48 sps:$4 sm:$0xff]  }
 0x176   : > { %2353 = vmatpush1.bf16.msra.mxu1 %v6319_v32  ;;  %4557 = vmatprep.subr.bf16.mxu0 %v6405_v47  ;;  %v6406_v32 = vld [vmem:[#allocation5 + $0x7f8] ss:$48 sps:$4 sm:$0xff]   ;;  %v6450_v47 = vld [vmem:[#allocation5 + $0x1ac] ss:$48 sps:$4 sm:$0xff]  }
 0x177   : > { %2354 = vmatprep.subr.bf16.mxu1 %v6327_v33  ;;  %v6414_v33 = vld [vmem:[#allocation5 + $0x85c] ss:$48 sps:$4 sm:$0xff]  }
 0x179   : > { %4558 = vmatpush1.bf16.msra.mxu0 %v6403_v50 }
 0x17a   : > { %2355 = vmatpush1.bf16.msra.mxu1 %v6325_v36  ;;  %4559 = vmatprep.subr.bf16.mxu0 %v6411_v51  ;;  %v6418_v36 = vld [vmem:[#allocation5 + $0x8b8] ss:$48 sps:$4 sm:$0xff]   ;;  %v6456_v51 = vld [vmem:[#allocation5 + $0x20c] ss:$48 sps:$4 sm:$0xff]  }
 0x17b   : > { %2356 = vmatprep.subr.bf16.mxu1 %v6333_v37  ;;  %v6426_v37 = vld [vmem:[#allocation5 + $0x2c] ss:$48 sps:$4 sm:$0xff]  }
 0x17d   : > { %4560 = vmatpush1.bf16.msra.mxu0 %v6409_v54 }
 0x17e   : > { %2357 = vmatpush1.bf16.msra.mxu1 %v6331_v40  ;;  %4561 = vmatprep.subr.bf16.mxu0 %v6417_v55  ;;  %v6430_v40 = vld [vmem:[#allocation5 + $0x88] ss:$48 sps:$4 sm:$0xff]   ;;  %v6462_v55 = vld [vmem:[#allocation5 + $0x26c] ss:$48 sps:$4 sm:$0xff]  }
 0x17f   : > { %2358 = vmatprep.subr.bf16.mxu1 %v6339_v41  ;;  %v6438_v41 = vld [vmem:[#allocation5 + $0xec] ss:$48 sps:$4 sm:$0xff]  }
 0x181   : > { %4562 = vmatpush1.bf16.msra.mxu0 %v6415_v58 }
 0x182   : > { %2359 = vmatpush1.bf16.msra.mxu1 %v6337_v44  ;;  %4563 = vmatprep.subr.bf16.mxu0 %v6423_v60  ;;  %v6444_v44 = vld [vmem:[#allocation5 + $0x14c] ss:$48 sps:$4 sm:$0xff]   ;;  %v6460_v60 = vld [vmem:[#allocation5 + $0x268] ss:$48 sps:$4 sm:$0xff]  }
 0x183   : > { %2360 = vmatprep.subr.bf16.mxu1 %v6345_v45  ;;  %v7369_v45 = vshrl.u32 %v594_v42, 7  ;;  %v6495_v42 = vld [vmem:[#allocation5 + $0x5cc] ss:$48 sps:$4 sm:$0xff]  }
 0x185   : > { %4564 = vmatpush1.bf16.msra.mxu0 %v6421_v63  ;;  %v7374_v50 = vsub.s32 0, %v7369_v45 }
 0x186   : > { %2361 = vmatpush1.bf16.msra.mxu1 %v6343_v48  ;;  %4565 = vmatprep.subr.bf16.mxu0 %v6429_v0  ;;  %v6448_v48 = vld [vmem:[#allocation5 + $0x1a8] ss:$48 sps:$4 sm:$0xff]  }
 0x187   : > { %2362 = vmatprep.subr.bf16.mxu1 %v6351_v49  ;;  %v7371_v49 = vld [vmem:[#allocation7] sm:$0xff] }
 0x189   : > { %4566 = vmatpush1.bf16.msra.mxu0 %v6427_v4  ;;  %v6466_v4 = vld [vmem:[#allocation5 + $0x2c8] ss:$48 sps:$4 sm:$0xff]  }
 0x18a   : > { %2363 = vmatpush1.bf16.msra.mxu1 %v6349_v52  ;;  %4567 = vmatprep.subr.bf16.mxu0 %v6435_v5  ;;  %v597_v52 = vrot.slane %v7371_v49, %v7374_v50  ;;  %v6490_v5 = vld [vmem:[#allocation8 + $0x180] ss:$12 sps:$4 sm:$0xff]  }
 0x18b   : > { %2364 = vmatprep.subr.bf16.mxu1 %v6357_v53  ;;  %v6454_v53 = vld [vmem:[#allocation5 + $0x208] ss:$48 sps:$4 sm:$0xff]  }
 0x18d   : > { %4568 = vmatpush1.bf16.msra.mxu0 %v6433_v8  ;;  %v6471_v8 = vld [vmem:[#allocation5 + $0x32c] ss:$48 sps:$4 sm:$0xff]  }
 0x18e   : > { %2365 = vmatpush1.bf16.msra.mxu1 %v6355_v56  ;;  %4569 = vmatprep.subr.bf16.mxu0 %v6441_v9  ;;  %v6498_v9 = vld [vmem:[#allocation8 + $0x19c] ss:$12 sps:$4 sm:$0xff]  }
 0x18f   : > { %2366 = vmatprep.subr.bf16.mxu1 %v6363_v57 }
 0x191   : > { %4570 = vmatpush1.bf16.msra.mxu0 %v6439_v12  ;;  %v6474_v12 = vld [vmem:[#allocation5 + $0x38c] ss:$48 sps:$4 sm:$0xff]  }
 0x192   : > { %2367 = vmatpush1.bf16.msra.mxu1 %v6361_v61  ;;  %4571 = vmatprep.subr.bf16.mxu0 %v6447_v13  ;;  %v6504_v13 = vld [vmem:[#allocation8 + $0x1b4] ss:$12 sps:$4 sm:$0xff]  }
 0x193   : > { %2368 = vmatprep.subr.bf16.mxu1 %v6369_v62 }
 0x195   : > { %4572 = vmatpush1.bf16.msra.mxu0 %v6445_v16  ;;  %v6477_v16 = vld [vmem:[#allocation5 + $0x3ec] ss:$48 sps:$4 sm:$0xff]  }
 0x196   : > { %2369 = vmatpush1.bf16.msra.mxu1 %v6367_v2  ;;  %4573 = vmatprep.subr.bf16.mxu0 %v6453_v17  ;;  %v6468_v2 = vld [vmem:[#allocation5 + $0x2cc] ss:$48 sps:$4 sm:$0xff]   ;;  %v6510_v17 = vld [vmem:[#allocation8 + $0x1cc] ss:$12 sps:$4 sm:$0xff]  }
 0x197   : > { %2370 = vmatprep.subr.bf16.mxu1 %v6372_v3 }
 0x199   : > { %4574 = vmatpush1.bf16.msra.mxu0 %v6451_v20  ;;  %v6480_v20 = vld [vmem:[#allocation5 + $0x44c] ss:$48 sps:$4 sm:$0xff]  }
 0x19a   : > { %2371 = vmatpush1.bf16.msra.mxu1 %v6370_v6  ;;  %4575 = vmatprep.subr.bf16.mxu0 %v6459_v22  ;;  %v6516_v22 = vld [vmem:[#allocation8 + $0x1e4] ss:$12 sps:$4 sm:$0xff]  }
 0x19b   : > { %2381 = vmatprep.subr.bf16.mxu1 %v6378_v7 }
 0x19d   : > { %2373 = vmatmul.mubr.bf16.vlgmr.msra.gmra.mrb[8].mxu1 %v7345_v59  ;;  %4576 = vmatpush1.bf16.msra.mxu0 %v6457_v25 }
 0x19e   : > { %2382 = vmatpush1.bf16.msra.mxu1 %v6376_v10  ;;  %2413 = vmatprep.mubr.bf16.mxu1 %v7081_v1  ;;  %v6469_v10 = vld [vmem:[#allocation5 + $0x328] ss:$48 sps:$4 sm:$0xff]  }
 0x19f   : > { %2383 = vmatprep.subr.bf16.mxu1 %v6384_v11  ;;  %4577 = vmatprep.subr.bf16.mxu0 %v6465_v26  ;;  %v6496_v11 = vld [vmem:[#allocation8 + $0x198] ss:$12 sps:$4 sm:$0xff]  }
 0x1a1   : > { %4578 = vmatpush1.bf16.msra.mxu0 %v6463_v29  ;;  %v6522_v29 = vld [vmem:[#allocation8 + $0x1fc] ss:$12 sps:$4 sm:$0xff]  }
 0x1a2   : > { %2384 = vmatpush1.bf16.msra.mxu1 %v6382_v14  ;;  %4588 = vmatprep.subr.bf16.mxu0 %v6492_v30  ;;  %v6472_v14 = vld [vmem:[#allocation5 + $0x388] ss:$48 sps:$4 sm:$0xff]  }
 0x1a3   : > { %2385 = vmatprep.subr.bf16.mxu1 %v6390_v15  ;;  %v6502_v15 = vld [vmem:[#allocation8 + $0x1b0] ss:$12 sps:$4 sm:$0xff]  }
 0x1a4   : > { %v6481_v30 = vld [vmem:[#allocation5 + $0x4a8] ss:$48 sps:$4 sm:$0xff]  }
 0x1a6   : > { %2386 = vmatpush1.bf16.msra.mxu1 %v6388_v18  ;;  %v6475_v18 = vld [vmem:[#allocation5 + $0x3e8] ss:$48 sps:$4 sm:$0xff]  }
 0x1a7   : > { %2387 = vmatprep.subr.bf16.mxu1 %v6396_v19  ;;  %v6508_v19 = vld [vmem:[#allocation8 + $0x1c8] ss:$12 sps:$4 sm:$0xff]  }
 0x1aa   : > { %2388 = vmatpush1.bf16.msra.mxu1 %v6394_v23  ;;  %v6478_v23 = vld [vmem:[#allocation5 + $0x448] ss:$48 sps:$4 sm:$0xff]  }
 0x1ab   : > { %2389 = vmatprep.subr.bf16.mxu1 %v6402_v24  ;;  %v6514_v24 = vld [vmem:[#allocation8 + $0x1e0] ss:$12 sps:$4 sm:$0xff]  }
 0x1ae   : > { %2390 = vmatpush1.bf16.msra.mxu1 %v6400_v27  ;;  %v6483_v27 = vld [vmem:[#allocation5 + $0x4ac] ss:$48 sps:$4 sm:$0xff]  }
 0x1af   : > { %2391 = vmatprep.subr.bf16.mxu1 %v6408_v28 }
 0x1b2   : > { %2392 = vmatpush1.bf16.msra.mxu1 %v6406_v32 }
 0x1b3   : > { %2393 = vmatprep.subr.bf16.mxu1 %v6414_v33  ;;  %v6520_v33 = vld [vmem:[#allocation8 + $0x1f8] ss:$12 sps:$4 sm:$0xff]  }
 0x1b6   : > { %2394 = vmatpush1.bf16.msra.mxu1 %v6412_v34  ;;  %v6486_v34 = vld [vmem:[#allocation5 + $0x50c] ss:$48 sps:$4 sm:$0xff]  }
 0x1b7   : > { %2395 = vmatprep.subr.bf16.mxu1 %v6420_v35  ;;  %v6528_v35 = vld [vmem:[#allocation8 + $0x214] ss:$12 sps:$4 sm:$0xff]  }
 0x1ba   : > { %2396 = vmatpush1.bf16.msra.mxu1 %v6418_v36  ;;  %v6484_v36 = vld [vmem:[#allocation5 + $0x508] ss:$48 sps:$4 sm:$0xff]  }
 0x1bb   : > { %2504 = vmatprep.subr.bf16.mxu1 %v6426_v37  ;;  %v6526_v37 = vld [vmem:[#allocation8 + $0x210] ss:$12 sps:$4 sm:$0xff]  }
 0x1bd   : > { %2414 = vmatmul.mubr.bf16.vlgmr.msra.gmra.mrb[8].mxu1 %v7352_v31 }
 0x1be   : > { %2505 = vmatpush1.bf16.msra.mxu1 %v6424_v38  ;;  %2536 = vmatprep.mubr.bf16.mxu1 %v7340_v21  ;;  %v7377_v21 = vsub.s32 1, %v7369_v45  ;;  %v6489_v38 = vld [vmem:[#allocation5 + $0x56c] ss:$48 sps:$4 sm:$0xff]  }
 0x1bf   : > { %2506 = vmatprep.subr.bf16.mxu1 %v6432_v39  ;;  %v6534_v39 = vld [vmem:[#allocation8 + $0x22c] ss:$12 sps:$4 sm:$0xff]  }
 0x1c0   : > { %v601_v54 = vrot.slane %v7371_v49, %v7377_v21 }
 0x1c2   : > { %2507 = vmatpush1.bf16.msra.mxu1 %v6430_v40  ;;  %v6487_v40 = vld [vmem:[#allocation5 + $0x568] ss:$48 sps:$4 sm:$0xff]  }
 0x1c3   : > { %2508 = vmatprep.subr.bf16.mxu1 %v6438_v41  ;;  %v6532_v41 = vld [vmem:[#allocation8 + $0x228] ss:$12 sps:$4 sm:$0xff]  }
 0x1c6   : > { %2509 = vmatpush1.bf16.msra.mxu1 %v6436_v43  ;;  %v6540_v43 = vld [vmem:[#allocation8 + $0x244] ss:$12 sps:$4 sm:$0xff]  }
 0x1c7   : > { %2510 = vmatprep.subr.bf16.mxu1 %v6444_v44  ;;  %v6493_v44 = vld [vmem:[#allocation5 + $0x5c8] ss:$48 sps:$4 sm:$0xff]  }
 0x1ca   : > { %2511 = vmatpush1.bf16.msra.mxu1 %v6442_v46  ;;  %v6501_v46 = vld [vmem:[#allocation5 + $0x62c] ss:$48 sps:$4 sm:$0xff]  }
 0x1cb   : > { %2512 = vmatprep.subr.bf16.mxu1 %v6450_v47  ;;  %v6538_v47 = vld [vmem:[#allocation8 + $0x240] ss:$12 sps:$4 sm:$0xff]  }
 0x1ce   : > { %2513 = vmatpush1.bf16.msra.mxu1 %v6448_v48  ;;  %v6546_v48 = vld [vmem:[#allocation8 + $0x25c] ss:$12 sps:$4 sm:$0xff]  }
 0x1cf   : > { %2514 = vmatprep.subr.bf16.mxu1 %v6456_v51  ;;  %v6499_v51 = vld [vmem:[#allocation5 + $0x628] ss:$48 sps:$4 sm:$0xff]  }
 0x1d0   : > { %v2169_v56 = vpop.f32.mrb[0].mxu1 }
 0x1d1   : > { %v5883_v57 = vadd.f32 %v2169_v56, %v597_v52  ;;  %v2171_v58 = vpop.f32.mrb[1].mxu1  ;;  %v6507_v52 = vld [vmem:[#allocation5 + $0x68c] ss:$48 sps:$4 sm:$0xff]  }
 0x1d2   : > { %v5884_v61 = vadd.f32 %v2171_v58, %v601_v54  ;;  %v2173_v62 = vpop.f32.mrb[2].mxu1  ;;  %2515 = vmatpush1.bf16.msra.mxu1 %v6454_v53  ;;  %v6544_v53 = vld [vmem:[#allocation8 + $0x258] ss:$12 sps:$4 sm:$0xff]   ;;  %v6551_v54 = vld [vmem:[#allocation8 + $0x274] ss:$12 sps:$4 sm:$0xff]  }
 0x1d3   : > { %v2586_v63 = vmax.f32 %v5883_v57, 0.0  ;;  %v2174_v0 = vpop.f32.mrb[3].mxu1  ;;  %2516 = vmatprep.subr.bf16.mxu1 %v6462_v55  ;;  %v6505_v55 = vld [vmem:[#allocation5 + $0x688] ss:$48 sps:$4 sm:$0xff]   ;;  %v6513_v56 = vld [vmem:[#allocation5 + $0x6ec] ss:$48 sps:$4 sm:$0xff]  }
 0x1d4   : > { %v2587_v3 = vmax.f32 %v5884_v61, 0.0  ;;  %v6549_v57 = vld [vmem:[#allocation8 + $0x270] ss:$12 sps:$4 sm:$0xff]   ;;  %v6556_v58 = vld [vmem:[#allocation8 + $0x28c] ss:$12 sps:$4 sm:$0xff]  }
 0x1d5   : > { %v7385_v7 = vpack.c.bf16 %v2586_v63, %v2586_v63  ;;  %v6519_v61 = vld [vmem:[#allocation5 + $0x74c] ss:$48 sps:$4 sm:$0xff]   ;;  %v6554_v62 = vld [vmem:[#allocation8 + $0x288] ss:$12 sps:$4 sm:$0xff]   ;;  %v6517_v0 = vld [vmem:[#allocation5 + $0x748] ss:$48 sps:$4 sm:$0xff]  }
 0x1d6   : > { %v7383_v6 = vpack.c.bf16 %v2587_v3, %v2587_v3  ;;  %2517 = vmatpush1.bf16.msra.mxu1 %v6460_v60  ;;  %v6511_v60 = vld [vmem:[#allocation5 + $0x6e8] ss:$48 sps:$4 sm:$0xff]   ;;  %v6561_v63 = vld [vmem:[#allocation8 + $0x2a4] ss:$12 sps:$4 sm:$0xff]  }
 0x1d7   : > { %2518 = vmatprep.subr.bf16.mxu1 %v6468_v2  ;;  %v7389_v25 = vpop.f32.mrb[0].mxu0  ;;  %v6566_v2 = vld [vmem:[#allocation8 + $0x2bc] ss:$12 sps:$4 sm:$0xff]  }
 0x1d8   : > { %4579 = vmatprep.mubr.bf16.mxu0 %v7383_v6  ;;  %v7391_v26 = vpop.f32.mrb[1].mxu0  ;;  %v6523_v3 = vld [vmem:[#allocation5 + $0x7a8] ss:$48 sps:$4 sm:$0xff]  }
 0x1d9   : > { %4580 = vmatmul.mubr.bf16.vlgmr.msra.gmra.mrb[8].mxu0 %v7385_v7  ;;  %v2337_v28 = vpop.f32.mrb[2].mxu0 }
 0x1da   : > { %2519 = vmatpush1.bf16.msra.mxu1 %v6466_v4  ;;  %4589 = vmatpush1.bf16.msra.mxu0 %v6490_v5  ;;  %v2338_v32 = vpop.f32.mrb[3].mxu0  ;;  %v6531_v4 = vld [vmem:[#allocation5 + $0x80c] ss:$48 sps:$4 sm:$0xff]   ;;  %v6564_v5 = vld [vmem:[#allocation8 + $0x2b8] ss:$12 sps:$4 sm:$0xff]  }
 0x1db   : > { %2520 = vmatprep.subr.bf16.mxu1 %v6471_v8  ;;  %4590 = vmatprep.subr.bf16.mxu0 %v6498_v9  ;;  %v6529_v8 = vld [vmem:[#allocation5 + $0x808] ss:$48 sps:$4 sm:$0xff]   ;;  %v6571_v9 = vld [vmem:[#allocation8 + $0x2d4] ss:$12 sps:$4 sm:$0xff]   ;;  %v7399_v32 = vsub.s32 2, %v7369_v45 }
 0x1dc   : > { %v6563_v28 = vld [vmem:[#allocation8 + $0x50] ss:$12 sps:$4 sm:$0xff]  }
 0x1de   : > { %2521 = vmatpush1.bf16.msra.mxu1 %v6469_v10  ;;  %4591 = vmatpush1.bf16.msra.mxu0 %v6496_v11  ;;  %v6537_v10 = vld [vmem:[#allocation5 + $0x86c] ss:$48 sps:$4 sm:$0xff]  }
 0x1df   : > { %2522 = vmatprep.subr.bf16.mxu1 %v6474_v12  ;;  %4592 = vmatprep.subr.bf16.mxu0 %v6504_v13  ;;  %v6569_v11 = vld [vmem:[#allocation8 + $0x2d0] ss:$12 sps:$4 sm:$0xff]   ;;  %v6576_v13 = vld [vmem:[#allocation8 + $0x2ec] ss:$12 sps:$4 sm:$0xff]  }
 0x1e0   : > { %v6535_v12 = vld [vmem:[#allocation5 + $0x868] ss:$48 sps:$4 sm:$0xff]  }
 0x1e2   : > { %2523 = vmatpush1.bf16.msra.mxu1 %v6472_v14  ;;  %4593 = vmatpush1.bf16.msra.mxu0 %v6502_v15  ;;  %v6543_v14 = vld [vmem:[#allocation5 + $0x8cc] ss:$48 sps:$4 sm:$0xff]   ;;  %v6574_v15 = vld [vmem:[#allocation8 + $0x2e8] ss:$12 sps:$4 sm:$0xff]  }
 0x1e3   : > { %2524 = vmatprep.subr.bf16.mxu1 %v6477_v16  ;;  %4594 = vmatprep.subr.bf16.mxu0 %v6510_v17  ;;  %v6581_v16 = vld [vmem:[#allocation8 + $0x304] ss:$12 sps:$4 sm:$0xff]   ;;  %v6541_v17 = vld [vmem:[#allocation5 + $0x8c8] ss:$48 sps:$4 sm:$0xff]  }
 0x1e6   : > { %2525 = vmatpush1.bf16.msra.mxu1 %v6475_v18  ;;  %4595 = vmatpush1.bf16.msra.mxu0 %v6508_v19  ;;  %v6547_v18 = vld [vmem:[#allocation8 + $0xc8] ss:$12 sps:$4 sm:$0xff]  }
 0x1e7   : > { %2526 = vmatprep.subr.bf16.mxu1 %v6480_v20  ;;  %4596 = vmatprep.subr.bf16.mxu0 %v6516_v22  ;;  %v6548_v19 = vld [vmem:[#allocation8 + $0x8] ss:$12 sps:$4 sm:$0xff]   ;;  %v6552_v20 = vld [vmem:[#allocation8 + $0xe0] ss:$12 sps:$4 sm:$0xff]  }
 0x1e8   : > { %v6553_v22 = vld [vmem:[#allocation8 + $0x20] ss:$12 sps:$4 sm:$0xff]  }
 0x1ea   : > { %2527 = vmatpush1.bf16.msra.mxu1 %v6478_v23  ;;  %4597 = vmatpush1.bf16.msra.mxu0 %v6514_v24  ;;  %v6557_v23 = vld [vmem:[#allocation8 + $0xf8] ss:$12 sps:$4 sm:$0xff]  }
 0x1eb   : > { %2528 = vmatprep.subr.bf16.mxu1 %v6483_v27  ;;  %4598 = vmatprep.subr.bf16.mxu0 %v6522_v29  ;;  %v6558_v24 = vld [vmem:[#allocation8 + $0x38] ss:$12 sps:$4 sm:$0xff]   ;;  %v6562_v27 = vld [vmem:[#allocation8 + $0x110] ss:$12 sps:$4 sm:$0xff]   ;;  %v6567_v29 = vld [vmem:[#allocation8 + $0x128] ss:$12 sps:$4 sm:$0xff]  }
 0x1ee   : > { %2529 = vmatpush1.bf16.msra.mxu1 %v6481_v30  ;;  %4599 = vmatpush1.bf16.msra.mxu0 %v6520_v33  ;;  %v616_v30 = vsub.s32 5, %v7369_v45  ;;  %v6572_v33 = vld [vmem:[#allocation8 + $0x140] ss:$12 sps:$4 sm:$0xff]  }
 0x1ef   : > { %2530 = vmatprep.subr.bf16.mxu1 %v6486_v34  ;;  %4600 = vmatprep.subr.bf16.mxu0 %v6528_v35  ;;  %v605_v35 = vrot.slane %v7371_v49, %v7399_v32 }
 0x1f0   : > { %v617_v34 = vrot.slane %v7371_v49, %v616_v30  ;;  %v6621_v30 = vld [vmem:[#allocation8 + $0x3c4] ss:$12 sps:$4 sm:$0xff]  }
 0x1f2   : > { %2531 = vmatpush1.bf16.msra.mxu1 %v6484_v36  ;;  %4601 = vmatpush1.bf16.msra.mxu0 %v6526_v37  ;;  %v6573_v37 = vld [vmem:[#allocation8 + $0x80] ss:$12 sps:$4 sm:$0xff]  }
 0x1f3   : > { %2532 = vmatprep.subr.bf16.mxu1 %v6489_v38  ;;  %4602 = vmatprep.subr.bf16.mxu0 %v6534_v39  ;;  %v6577_v38 = vld [vmem:[#allocation8 + $0x158] ss:$12 sps:$4 sm:$0xff]   ;;  %v5888_v39 = vadd.f32 %v7391_v26, %v617_v34  ;;  %v6583_v26 = vld [vmem:[#allocation8 + $0xb0] ss:$12 sps:$4 sm:$0xff]  }
 0x1f4   : > { %v6623_v34 = vld [vmem:[#allocation8 + $0x230] ss:$12 sps:$4 sm:$0xff]  }
 0x1f6   : > { %2533 = vmatpush1.bf16.msra.mxu1 %v6487_v40  ;;  %4603 = vmatpush1.bf16.msra.mxu0 %v6532_v41 }
 0x1f7   : > { %2534 = vmatprep.subr.bf16.mxu1 %v6495_v42  ;;  %4604 = vmatprep.subr.bf16.mxu0 %v6540_v43 }
 0x1fa   : > { %2535 = vmatpush1.bf16.msra.mxu1 %v6493_v44  ;;  %4605 = vmatpush1.bf16.msra.mxu0 %v6538_v47 }
 0x1fb   : > { %2545 = vmatprep.subr.bf16.mxu1 %v6501_v46  ;;  %4606 = vmatprep.subr.bf16.mxu0 %v6546_v48  ;;  %v6578_v46 = vld [vmem:[#allocation8 + $0x98] ss:$12 sps:$4 sm:$0xff]  }
 0x1fd   : > { %2537 = vmatmul.mubr.bf16.vlgmr.msra.gmra.mrb[12].mxu1 %v7345_v59  ;;  %v6525_v59 = vld [vmem:[#allocation5 + $0x7ac] ss:$48 sps:$4 sm:$0xff]  }
 0x1fe   : > { %2546 = vmatpush1.bf16.msra.mxu1 %v6499_v51  ;;  %2577 = vmatprep.mubr.bf16.mxu1 %v7081_v1  ;;  %v6559_v1 = vld [vmem:[#allocation8 + $0x2a0] ss:$12 sps:$4 sm:$0xff]   ;;  %v6582_v51 = vld [vmem:[#allocation8 + $0x170] ss:$12 sps:$4 sm:$0xff]  }
 0x1ff   : > { %2547 = vmatprep.subr.bf16.mxu1 %v6507_v52  ;;  %4607 = vmatpush1.bf16.msra.mxu0 %v6544_v53  ;;  %v2591_v52 = vmax.f32 %v5888_v39, 0.0  ;;  %v6631_v39 = vld [vmem:[#allocation8 + $0x3f4] ss:$12 sps:$4 sm:$0xff]  }
 0x200   : > { %4608 = vmatprep.subr.bf16.mxu0 %v6551_v54 }
 0x202   : > { %2548 = vmatpush1.bf16.msra.mxu1 %v6505_v55  ;;  %v6579_v55 = vld [vmem:[#allocation8 + $0x300] ss:$12 sps:$4 sm:$0xff]  }
 0x203   : > { %2549 = vmatprep.subr.bf16.mxu1 %v6513_v56  ;;  %4609 = vmatpush1.bf16.msra.mxu0 %v6549_v57  ;;  %v6586_v57 = vld [vmem:[#allocation8 + $0x31c] ss:$12 sps:$4 sm:$0xff]  }
 0x204   : > { %4610 = vmatprep.subr.bf16.mxu0 %v6556_v58  ;;  %v7411_v58 = vpack.c.bf16 %v2591_v52, %v2591_v52  ;;  %v6639_v52 = vld [vmem:[#allocation8 + $0x420] ss:$12 sps:$4 sm:$0xff]  }
 0x206   : > { %2550 = vmatpush1.bf16.msra.mxu1 %v6511_v60  ;;  %v6587_v60 = vld [vmem:[#allocation8 + $0x248] ss:$12 sps:$4 sm:$0xff]  }
 0x207   : > { %2551 = vmatprep.subr.bf16.mxu1 %v6519_v61  ;;  %4611 = vmatpush1.bf16.msra.mxu0 %v6554_v62  ;;  %v6584_v61 = vld [vmem:[#allocation8 + $0x318] ss:$12 sps:$4 sm:$0xff]   ;;  %v6588_v62 = vld [vmem:[#allocation8 + $0x188] ss:$12 sps:$4 sm:$0xff]  }
 0x208   : > { %4612 = vmatprep.subr.bf16.mxu0 %v6561_v63  ;;  %v6591_v63 = vld [vmem:[#allocation8 + $0x334] ss:$12 sps:$4 sm:$0xff]  }
 0x20a   : > { %2552 = vmatpush1.bf16.msra.mxu1 %v6517_v0  ;;  %v6592_v0 = vld [vmem:[#allocation8 + $0x260] ss:$12 sps:$4 sm:$0xff]  }
 0x20b   : > { %2553 = vmatprep.subr.bf16.mxu1 %v6525_v59  ;;  %4613 = vmatpush1.bf16.msra.mxu0 %v6559_v1  ;;  %v6589_v59 = vld [vmem:[#allocation8 + $0x330] ss:$12 sps:$4 sm:$0xff]   ;;  %v6593_v1 = vld [vmem:[#allocation8 + $0x1a0] ss:$12 sps:$4 sm:$0xff]  }
 0x20c   : > { %4614 = vmatprep.subr.bf16.mxu0 %v6566_v2  ;;  %v6596_v2 = vld [vmem:[#allocation8 + $0x34c] ss:$12 sps:$4 sm:$0xff]  }
 0x20e   : > { %2554 = vmatpush1.bf16.msra.mxu1 %v6523_v3  ;;  %v6597_v3 = vld [vmem:[#allocation8 + $0x278] ss:$12 sps:$4 sm:$0xff]  }
 0x20f   : > { %2555 = vmatprep.subr.bf16.mxu1 %v6531_v4  ;;  %4615 = vmatpush1.bf16.msra.mxu0 %v6564_v5  ;;  %v6594_v4 = vld [vmem:[#allocation8 + $0x348] ss:$12 sps:$4 sm:$0xff]   ;;  %v6598_v5 = vld [vmem:[#allocation8 + $0x1b8] ss:$12 sps:$4 sm:$0xff]  }
 0x210   : > { %4616 = vmatprep.subr.bf16.mxu0 %v6571_v9  ;;  %v6602_v9 = vld [vmem:[#allocation8 + $0x290] ss:$12 sps:$4 sm:$0xff]  }
 0x212   : > { %2556 = vmatpush1.bf16.msra.mxu1 %v6529_v8  ;;  %v6601_v8 = vld [vmem:[#allocation8 + $0x364] ss:$12 sps:$4 sm:$0xff]  }
 0x213   : > { %2557 = vmatprep.subr.bf16.mxu1 %v6537_v10  ;;  %4617 = vmatpush1.bf16.msra.mxu0 %v6569_v11 }
 0x214   : > { %4618 = vmatprep.subr.bf16.mxu0 %v6576_v13  ;;  %v6606_v13 = vld [vmem:[#allocation8 + $0x37c] ss:$12 sps:$4 sm:$0xff]  }
 0x216   : > { %2558 = vmatpush1.bf16.msra.mxu1 %v6535_v12  ;;  %v6603_v12 = vld [vmem:[#allocation8 + $0x1d0] ss:$12 sps:$4 sm:$0xff]  }
 0x217   : > { %2559 = vmatprep.subr.bf16.mxu1 %v6543_v14  ;;  %4619 = vmatpush1.bf16.msra.mxu0 %v6574_v15  ;;  %v6607_v15 = vld [vmem:[#allocation8 + $0x2a8] ss:$12 sps:$4 sm:$0xff]  }
 0x218   : > { %4629 = vmatprep.subr.bf16.mxu0 %v6581_v16 }
 0x21a   : > { %2560 = vmatpush1.bf16.msra.mxu1 %v6541_v17  ;;  %v6604_v17 = vld [vmem:[#allocation8 + $0x378] ss:$12 sps:$4 sm:$0xff]  }
 0x21b   : > { %5751 = vmatprep.subr.bf16.mxu1 %v6547_v18  ;;  %v6608_v18 = vld [vmem:[#allocation8 + $0x1e8] ss:$12 sps:$4 sm:$0xff]  }
 0x21d   : > { %2578 = vmatmul.mubr.bf16.vlgmr.msra.gmra.mrb[12].mxu1 %v7352_v31  ;;  %v6568_v31 = vld [vmem:[#allocation8 + $0x68] ss:$12 sps:$4 sm:$0xff]  }
 0x21e   : > { %5752 = vmatpush3.bf16.msra.mxu1 %v6548_v19  ;;  %4825 = vmatprep.mubr.bf16.mxu1 %v7383_v6  ;;  %v608_v6 = vsub.s32 3, %v7369_v45  ;;  %v6611_v19 = vld [vmem:[#allocation8 + $0x394] ss:$12 sps:$4 sm:$0xff]  }
 0x21f   : > { %5753 = vmatprep.subr.bf16.mxu1 %v6552_v20  ;;  %v6612_v20 = vld [vmem:[#allocation8 + $0x2c0] ss:$12 sps:$4 sm:$0xff]  }
 0x220   : > { %v609_v36 = vrot.slane %v7371_v49, %v608_v6 }
 0x222   : > { %5754 = vmatpush3.bf16.msra.mxu1 %v6553_v22  ;;  %v6609_v22 = vld [vmem:[#allocation8 + $0x390] ss:$12 sps:$4 sm:$0xff]  }
 0x223   : > { %5755 = vmatprep.subr.bf16.mxu1 %v6557_v23  ;;  %v6613_v23 = vld [vmem:[#allocation8 + $0x200] ss:$12 sps:$4 sm:$0xff]  }
 0x226   : > { %5756 = vmatpush3.bf16.msra.mxu1 %v6558_v24  ;;  %v6616_v24 = vld [vmem:[#allocation8 + $0x3ac] ss:$12 sps:$4 sm:$0xff]  }
 0x227   : > { %5757 = vmatprep.subr.bf16.mxu1 %v6562_v27  ;;  %v6617_v27 = vld [vmem:[#allocation8 + $0x2d8] ss:$12 sps:$4 sm:$0xff]  }
 0x22a   : > { %5758 = vmatpush3.bf16.msra.mxu1 %v6563_v28  ;;  %v6614_v28 = vld [vmem:[#allocation8 + $0x3a8] ss:$12 sps:$4 sm:$0xff]  }
 0x22b   : > { %5759 = vmatprep.subr.bf16.mxu1 %v6567_v29  ;;  %v6618_v29 = vld [vmem:[#allocation8 + $0x218] ss:$12 sps:$4 sm:$0xff]  }
 0x22e   : > { %5760 = vmatpush3.bf16.msra.mxu1 %v6568_v31  ;;  %v6622_v31 = vld [vmem:[#allocation8 + $0x2f0] ss:$12 sps:$4 sm:$0xff]  }
 0x22f   : > { %5761 = vmatprep.subr.bf16.mxu1 %v6572_v33  ;;  %v6619_v33 = vld [vmem:[#allocation8 + $0x3c0] ss:$12 sps:$4 sm:$0xff]  }
 0x230   : > { %v2251_v40 = vpop.f32.mrb[4].mxu1 }
 0x231   : > { %v5885_v41 = vadd.f32 %v2251_v40, %v605_v35  ;;  %v2253_v42 = vpop.f32.mrb[5].mxu1  ;;  %v6626_v35 = vld [vmem:[#allocation8 + $0x3dc] ss:$12 sps:$4 sm:$0xff]   ;;  %v6632_v40 = vld [vmem:[#allocation8 + $0x3e0] ss:$12 sps:$4 sm:$0xff]  }
 0x232   : > { %v5886_v43 = vadd.f32 %v2253_v42, %v609_v36  ;;  %v2255_v44 = vpop.f32.mrb[6].mxu1  ;;  %5762 = vmatpush3.bf16.msra.mxu1 %v6573_v37  ;;  %v6627_v36 = vld [vmem:[#allocation8 + $0x3c8] ss:$12 sps:$4 sm:$0xff]   ;;  %v6624_v37 = vld [vmem:[#allocation8 + $0x3d8] ss:$12 sps:$4 sm:$0xff]  }
 0x233   : > { %v2588_v47 = vmax.f32 %v5885_v41, 0.0  ;;  %v2256_v48 = vpop.f32.mrb[7].mxu1  ;;  %5763 = vmatprep.subr.bf16.mxu1 %v6577_v38  ;;  %v6628_v38 = vld [vmem:[#allocation8 + $0x308] ss:$12 sps:$4 sm:$0xff]   ;;  %v6629_v41 = vld [vmem:[#allocation8 + $0x3f0] ss:$12 sps:$4 sm:$0xff]  }
 0x234   : > { %v2589_v53 = vmax.f32 %v5886_v43, 0.0  ;;  %v6633_v42 = vld [vmem:[#allocation8 + $0x320] ss:$12 sps:$4 sm:$0xff]   ;;  %v6637_v44 = vld [vmem:[#allocation8 + $0x3f8] ss:$12 sps:$4 sm:$0xff]  }
 0x235   : > { %v7409_v56 = vpack.c.bf16 %v2588_v47, %v2588_v47  ;;  %v6636_v43 = vld [vmem:[#allocation8 + $0x40c] ss:$12 sps:$4 sm:$0xff]   ;;  %v6641_v48 = vld [vmem:[#allocation8 + $0x424] ss:$12 sps:$4 sm:$0xff]  }
 0x236   : > { %v2601_v54 = vpack.c.bf16 %v2589_v53, %v2589_v53  ;;  %5764 = vmatpush3.bf16.msra.mxu1 %v6578_v46  ;;  %v6634_v46 = vld [vmem:[#allocation8 + $0x408] ss:$12 sps:$4 sm:$0xff]   ;;  %v6638_v47 = vld [vmem:[#allocation8 + $0x338] ss:$12 sps:$4 sm:$0xff]   ;;  %v612_v53 = vsub.s32 4, %v7369_v45 }
 0x237   : > { %5765 = vmatprep.subr.bf16.mxu1 %v6582_v51  ;;  %v7416_v10 = vpop.f32.mrb[4].mxu0  ;;  %v6642_v51 = vld [vmem:[#allocation8 + $0x410] ss:$12 sps:$4 sm:$0xff]  }
 0x238   : > { %4620 = vmatprep.mubr.bf16.mxu0 %v2601_v54  ;;  %v7418_v11 = vpop.f32.mrb[5].mxu0 }
 0x239   : > { %4621 = vmatmul.mubr.bf16.vlgmr.msra.gmra.mrb[8].mxu0 %v7409_v56  ;;  %v2501_v14 = vpop.f32.mrb[6].mxu0 }
 0x23a   : > { %4630 = vmatpush1.bf16.msra.mxu0 %v6579_v55  ;;  %4661 = vmatprep.mubr.bf16.mxu0 %v7411_v58  ;;  %v2502_v16 = vpop.f32.mrb[7].mxu0  ;;  %v6646_v55 = vld [vmem:[#allocation8 + $0x43c] ss:$12 sps:$4 sm:$0xff]  }
 0x23b   : > { %5766 = vmatpush3.bf16.msra.mxu1 %v6583_v26  ;;  %4631 = vmatprep.subr.bf16.mxu0 %v6586_v57  ;;  %v6644_v26 = vld [vmem:[#allocation8 + $0x438] ss:$12 sps:$4 sm:$0xff]   ;;  %v613_v57 = vrot.slane %v7371_v49, %v612_v53  ;;  %v6668_v14 = vld [vmem:[#allocation8 + $0x488] ss:$12 sps:$4 sm:$0xff]   ;;  %v6672_v16 = vld [vmem:[#allocation8 + $0x560] ss:$12 sps:$4 sm:$0xff]  }
 0x23c   : > { %5773 = vmatprep.subr.bf16.mxu1 %v6587_v60  ;;  %v6651_v60 = vld [vmem:[#allocation8 + $0x454] ss:$12 sps:$4 sm:$0xff]   ;;  %v6658_v49 = vld [vmem:[#allocation8 + $0x398] ss:$12 sps:$4 sm:$0xff]  }
 0x23e   : > { %4632 = vmatpush1.bf16.msra.mxu0 %v6584_v61  ;;  %4826 = vmatmul.mubr.bf16.vlgmr.msra.gmra.mrb[16].mxu1 %v7385_v7  ;;  %v6599_v7 = vld [vmem:[#allocation8 + $0x360] ss:$12 sps:$4 sm:$0xff]  }
 0x23f   : > { %5774 = vmatpush3.bf16.msra.mxu1 %v6588_v62  ;;  %4865 = vmatprep.mubr.bf16.mxu1 %v2601_v54  ;;  %v6643_v54 = vld [vmem:[#allocation8 + $0x350] ss:$12 sps:$4 sm:$0xff]   ;;  %v6652_v61 = vld [vmem:[#allocation8 + $0x440] ss:$12 sps:$4 sm:$0xff]  }
 0x240   : > { %4633 = vmatprep.subr.bf16.mxu0 %v6591_v63  ;;  %5775 = vmatprep.subr.bf16.mxu1 %v6592_v0  ;;  %v6649_v62 = vld [vmem:[#allocation8 + $0x450] ss:$12 sps:$4 sm:$0xff]   ;;  %v5887_v63 = vadd.f32 %v7389_v25, %v613_v57  ;;  %v6653_v0 = vld [vmem:[#allocation8 + $0x380] ss:$12 sps:$4 sm:$0xff]  }
 0x241   : > { %v6663_v25 = vld [vmem:[#allocation8 + $0x3b0] ss:$12 sps:$4 sm:$0xff]  }
 0x242   : > { %4634 = vmatpush1.bf16.msra.mxu0 %v6589_v59  ;;  %v6656_v59 = vld [vmem:[#allocation8 + $0x46c] ss:$12 sps:$4 sm:$0xff]   ;;  %v6701_v57 = vld [vmem:[#allocation8 + $0x544] ss:$12 sps:$4 sm:$0xff]  }
 0x243   : > { %5776 = vmatpush3.bf16.msra.mxu1 %v6593_v1  ;;  %4635 = vmatprep.subr.bf16.mxu0 %v6596_v2  ;;  %v6657_v1 = vld [vmem:[#allocation8 + $0x458] ss:$12 sps:$4 sm:$0xff]   ;;  %v6654_v2 = vld [vmem:[#allocation8 + $0x468] ss:$12 sps:$4 sm:$0xff]  }
 0x244   : > { %5777 = vmatprep.subr.bf16.mxu1 %v6597_v3  ;;  %v2590_v3 = vmax.f32 %v5887_v63, 0.0 }
 0x246   : > { %4636 = vmatpush1.bf16.msra.mxu0 %v6594_v4  ;;  %v6661_v4 = vld [vmem:[#allocation8 + $0x484] ss:$12 sps:$4 sm:$0xff]  }
 0x247   : > { %5778 = vmatpush3.bf16.msra.mxu1 %v6598_v5  ;;  %4637 = vmatprep.subr.bf16.mxu0 %v6601_v8  ;;  %v6662_v5 = vld [vmem:[#allocation8 + $0x470] ss:$12 sps:$4 sm:$0xff]   ;;  %v6659_v8 = vld [vmem:[#allocation8 + $0x480] ss:$12 sps:$4 sm:$0xff]  }
 0x248   : > { %5779 = vmatprep.subr.bf16.mxu1 %v6602_v9  ;;  %v2602_v9 = vpack.c.bf16 %v2590_v3, %v2590_v3  ;;  %v6707_v3 = vld [vmem:[#allocation8 + $0x6c8] ss:$12 sps:$4 sm:$0xff]  }
 0x24a   : > { %4638 = vmatpush1.bf16.msra.mxu0 %v6599_v7  ;;  %v6666_v7 = vld [vmem:[#allocation8 + $0x49c] ss:$12 sps:$4 sm:$0xff]  }
 0x24b   : > { %5780 = vmatpush3.bf16.msra.mxu1 %v6603_v12  ;;  %4639 = vmatprep.subr.bf16.mxu0 %v6606_v13  ;;  %v6667_v12 = vld [vmem:[#allocation8 + $0x548] ss:$12 sps:$4 sm:$0xff]   ;;  %v6664_v13 = vld [vmem:[#allocation8 + $0x498] ss:$12 sps:$4 sm:$0xff]  }
 0x24c   : > { %5781 = vmatprep.subr.bf16.mxu1 %v6607_v15  ;;  %v6671_v15 = vld [vmem:[#allocation8 + $0x4b4] ss:$12 sps:$4 sm:$0xff]  }
 0x24e   : > { %4640 = vmatpush1.bf16.msra.mxu0 %v6604_v17  ;;  %v6669_v17 = vld [vmem:[#allocation8 + $0x4b0] ss:$12 sps:$4 sm:$0xff]  }
 0x24f   : > { %5782 = vmatpush3.bf16.msra.mxu1 %v6608_v18  ;;  %4641 = vmatprep.subr.bf16.mxu0 %v6611_v19  ;;  %v6673_v18 = vld [vmem:[#allocation8 + $0x4a0] ss:$12 sps:$4 sm:$0xff]  }
 0x250   : > { %5783 = vmatprep.subr.bf16.mxu1 %v6612_v20  ;;  %v6676_v19 = vld [vmem:[#allocation8 + $0x4cc] ss:$12 sps:$4 sm:$0xff]  }
 0x251   : > { %v6677_v20 = vld [vmem:[#allocation8 + $0x578] ss:$12 sps:$4 sm:$0xff]  }
 0x252   : > { %4642 = vmatpush1.bf16.msra.mxu0 %v6609_v22  ;;  %v6674_v22 = vld [vmem:[#allocation8 + $0x4c8] ss:$12 sps:$4 sm:$0xff]  }
 0x253   : > { %5784 = vmatpush3.bf16.msra.mxu1 %v6613_v23  ;;  %4643 = vmatprep.subr.bf16.mxu0 %v6616_v24  ;;  %v6678_v23 = vld [vmem:[#allocation8 + $0x4b8] ss:$12 sps:$4 sm:$0xff]  }
 0x254   : > { %5785 = vmatprep.subr.bf16.mxu1 %v6617_v27  ;;  %v6681_v24 = vld [vmem:[#allocation8 + $0x4e4] ss:$12 sps:$4 sm:$0xff]  }
 0x255   : > { %v6682_v27 = vld [vmem:[#allocation8 + $0x590] ss:$12 sps:$4 sm:$0xff]  }
 0x256   : > { %4644 = vmatpush1.bf16.msra.mxu0 %v6614_v28  ;;  %v6679_v28 = vld [vmem:[#allocation8 + $0x4e0] ss:$12 sps:$4 sm:$0xff]  }
 0x257   : > { %5786 = vmatpush3.bf16.msra.mxu1 %v6618_v29  ;;  %4645 = vmatprep.subr.bf16.mxu0 %v6621_v30  ;;  %v6683_v29 = vld [vmem:[#allocation8 + $0x4d0] ss:$12 sps:$4 sm:$0xff]  }
 0x258   : > { %5787 = vmatprep.subr.bf16.mxu1 %v6622_v31  ;;  %v6686_v30 = vld [vmem:[#allocation8 + $0x4fc] ss:$12 sps:$4 sm:$0xff]  }
 0x259   : > { %v6687_v31 = vld [vmem:[#allocation8 + $0x5a8] ss:$12 sps:$4 sm:$0xff]  }
 0x25a   : > { %4646 = vmatpush1.bf16.msra.mxu0 %v6619_v33  ;;  %v6684_v33 = vld [vmem:[#allocation8 + $0x4f8] ss:$12 sps:$4 sm:$0xff]  }
 0x25b   : > { %5788 = vmatpush3.bf16.msra.mxu1 %v6623_v34  ;;  %4647 = vmatprep.subr.bf16.mxu0 %v6626_v35  ;;  %v624_v34 = vsub.s32 7, %v7369_v45  ;;  %v6688_v35 = vld [vmem:[#allocation8 + $0x4e8] ss:$12 sps:$4 sm:$0xff]  }
 0x25c   : > { %5795 = vmatprep.subr.bf16.mxu1 %v6627_v36  ;;  %v6691_v36 = vld [vmem:[#allocation8 + $0x514] ss:$12 sps:$4 sm:$0xff]  }
 0x25e   : > { %4648 = vmatpush1.bf16.msra.mxu0 %v6624_v37  ;;  %4866 = vmatmul.mubr.bf16.vlgmr.msra.gmra.mrb[20].mxu1 %v7409_v56  ;;  %v6647_v56 = vld [vmem:[#allocation8 + $0x428] ss:$12 sps:$4 sm:$0xff]   ;;  %v620_v37 = vsub.s32 6, %v7369_v45  ;;  %v6805_v45 = vld [vmem:[#allocation8 + $0x780] ss:$12 sps:$4 sm:$0xff]  }
 0x25f   : > { %5796 = vmatpush3.bf16.msra.mxu1 %v6628_v38  ;;  %4905 = vmatprep.mubr.bf16.mxu1 %v7411_v58  ;;  %v6648_v58 = vld [vmem:[#allocation8 + $0x368] ss:$12 sps:$4 sm:$0xff]   ;;  %v6692_v38 = vld [vmem:[#allocation8 + $0x5c0] ss:$12 sps:$4 sm:$0xff]  }
 0x260   : > { %4649 = vmatprep.subr.bf16.mxu0 %v6631_v39  ;;  %5797 = vmatprep.subr.bf16.mxu1 %v6632_v40  ;;  %v7427_v39 = vld [vmem:[#allocation7 + $0x8] sm:$0xf] }
 0x261   : > { %v6689_v40 = vld [vmem:[#allocation8 + $0x510] ss:$12 sps:$4 sm:$0xff]  }
 0x262   : > { %4650 = vmatpush1.bf16.msra.mxu0 %v6629_v41  ;;  %v6853_v41 = vld [vmem:[#allocation7] sm:$0xff] }
 0x263   : > { %5798 = vmatpush3.bf16.msra.mxu1 %v6633_v42  ;;  %4651 = vmatprep.subr.bf16.mxu0 %v6636_v43  ;;  %v625_v42 = vrot.slane %v6853_v41, %v624_v34  ;;  %v6693_v43 = vld [vmem:[#allocation8 + $0x500] ss:$12 sps:$4 sm:$0xff]   ;;  %v629_v34 = vrot.slane %v7427_v39, %v7374_v50 }
 0x264   : > { %5799 = vmatprep.subr.bf16.mxu1 %v6637_v44  ;;  %v6696_v44 = vld [vmem:[#allocation8 + $0x52c] ss:$12 sps:$4 sm:$0xff]  }
 0x266   : > { %4652 = vmatpush1.bf16.msra.mxu0 %v6634_v46  ;;  %v621_v46 = vrot.slane %v6853_v41, %v620_v37  ;;  %v6738_v37 = vld [vmem:[#allocation8 + $0x698] ss:$12 sps:$4 sm:$0xff]   ;;  %v6742_v41 = vld [vmem:[#allocation8 + $0x770] ss:$12 sps:$4 sm:$0xff]  }
 0x267   : > { %5800 = vmatpush3.bf16.msra.mxu1 %v6638_v47  ;;  %4653 = vmatprep.subr.bf16.mxu0 %v6641_v48  ;;  %v6697_v48 = vld [vmem:[#allocation8 + $0x5d8] ss:$12 sps:$4 sm:$0xff]  }
 0x268   : > { %5801 = vmatprep.subr.bf16.mxu1 %v6642_v51  ;;  %v633_v51 = vrot.slane %v7427_v39, %v7377_v21 }
 0x26a   : > { %4654 = vmatpush1.bf16.msra.mxu0 %v6639_v52 }
 0x26b   : > { %5802 = vmatpush3.bf16.msra.mxu1 %v6643_v54  ;;  %4655 = vmatprep.subr.bf16.mxu0 %v6646_v55  ;;  %v6694_v55 = vld [vmem:[#allocation8 + $0x528] ss:$12 sps:$4 sm:$0xff]  }
 0x26c   : > { %5803 = vmatprep.subr.bf16.mxu1 %v6647_v56 }
 0x26e   : > { %4656 = vmatpush1.bf16.msra.mxu0 %v6644_v26  ;;  %v6698_v26 = vld [vmem:[#allocation8 + $0x518] ss:$12 sps:$4 sm:$0xff]  }
 0x26f   : > { %5804 = vmatpush3.bf16.msra.mxu1 %v6648_v58  ;;  %4657 = vmatprep.subr.bf16.mxu0 %v6651_v60 }
 0x270   : > { %5805 = vmatprep.subr.bf16.mxu1 %v6652_v61  ;;  %v5892_v61 = vadd.f32 %v7418_v11, %v633_v51  ;;  %v6769_v51 = vld [vmem:[#allocation8 + $0x788] ss:$12 sps:$4 sm:$0xff]  }
 0x272   : > { %4658 = vmatpush1.bf16.msra.mxu0 %v6649_v62  ;;  %v6702_v62 = vld [vmem:[#allocation8 + $0x5f0] ss:$12 sps:$4 sm:$0xff]  }
 0x273   : > { %5806 = vmatpush3.bf16.msra.mxu1 %v6653_v0  ;;  %4659 = vmatprep.subr.bf16.mxu0 %v6656_v59  ;;  %v6699_v0 = vld [vmem:[#allocation8 + $0x540] ss:$12 sps:$4 sm:$0xff]   ;;  %v6703_v59 = vld [vmem:[#allocation8 + $0x530] ss:$12 sps:$4 sm:$0xff]  }
 0x274   : > { %5807 = vmatprep.subr.bf16.mxu1 %v6657_v1  ;;  %v6706_v1 = vld [vmem:[#allocation8 + $0x55c] ss:$12 sps:$4 sm:$0xff]  }
 0x276   : > { %4660 = vmatpush1.bf16.msra.mxu0 %v6654_v2 }
 0x277   : > { %5808 = vmatpush3.bf16.msra.mxu1 %v6658_v49  ;;  %4670 = vmatprep.subr.bf16.mxu0 %v6661_v4  ;;  %v2595_v49 = vmax.f32 %v5892_v61, 0.0  ;;  %v6704_v4 = vld [vmem:[#allocation8 + $0x558] ss:$12 sps:$4 sm:$0xff]   ;;  %v6783_v61 = vld [vmem:[#allocation8 + $0x890] ss:$12 sps:$4 sm:$0xff]  }
 0x278   : > { %5809 = vmatprep.subr.bf16.mxu1 %v6662_v5  ;;  %v6708_v5 = vld [vmem:[#allocation8 + $0x608] ss:$12 sps:$4 sm:$0xff]  }
 0x279   : > { %4662 = vmatmul.mubr.bf16.vlgmr.msra.gmra.mrb[8].mxu0 %v2602_v9 }
 0x27a   : > { %4671 = vmatpush1.bf16.msra.mxu0 %v6659_v8  ;;  %v6711_v8 = vld [vmem:[#allocation8 + $0x574] ss:$12 sps:$4 sm:$0xff]  }
 0x27b   : > { %5810 = vmatpush3.bf16.msra.mxu1 %v6663_v25  ;;  %4672 = vmatprep.subr.bf16.mxu0 %v6666_v7  ;;  %v7434_v25 = vpack.c.bf16 %v2595_v49, %v2595_v49  ;;  %v6709_v7 = vld [vmem:[#allocation8 + $0x570] ss:$12 sps:$4 sm:$0xff]   ;;  %v6793_v49 = vld [vmem:[#allocation8 + $0x8c0] ss:$12 sps:$4 sm:$0xff]  }
 0x27c   : > { %5817 = vmatprep.subr.bf16.mxu1 %v6667_v12  ;;  %v6713_v12 = vld [vmem:[#allocation8 + $0x620] ss:$12 sps:$4 sm:$0xff]  }
 0x27e   : > { %4673 = vmatpush1.bf16.msra.mxu0 %v6664_v13  ;;  %4906 = vmatmul.mubr.bf16.vlgmr.msra.gmra.mrb[24].mxu1 %v2602_v9  ;;  %v6712_v9 = vld [vmem:[#allocation8 + $0x6e0] ss:$12 sps:$4 sm:$0xff]  }
 0x27f   : > { %5818 = vmatpush3.bf16.msra.mxu1 %v6668_v14  ;;  %4674 = vmatprep.subr.bf16.mxu0 %v6671_v15  ;;  %v6716_v13 = vld [vmem:[#allocation8 + $0x58c] ss:$12 sps:$4 sm:$0xff]   ;;  %v6714_v15 = vld [vmem:[#allocation8 + $0x588] ss:$12 sps:$4 sm:$0xff]  }
 0x280   : > { %5819 = vmatprep.subr.bf16.mxu1 %v6672_v16  ;;  %v6717_v14 = vld [vmem:[#allocation8 + $0x6f8] ss:$12 sps:$4 sm:$0xff]  }
 0x281   : > { %v6718_v16 = vld [vmem:[#allocation8 + $0x638] ss:$12 sps:$4 sm:$0xff]  }
 0x282   : > { %4675 = vmatpush1.bf16.msra.mxu0 %v6669_v17  ;;  %v6721_v17 = vld [vmem:[#allocation8 + $0x5a4] ss:$12 sps:$4 sm:$0xff]  }
 0x283   : > { %5820 = vmatpush3.bf16.msra.mxu1 %v6673_v18  ;;  %4676 = vmatprep.subr.bf16.mxu0 %v6676_v19  ;;  %v6722_v18 = vld [vmem:[#allocation8 + $0x710] ss:$12 sps:$4 sm:$0xff]   ;;  %v6719_v19 = vld [vmem:[#allocation8 + $0x5a0] ss:$12 sps:$4 sm:$0xff]  }
 0x284   : > { %5821 = vmatprep.subr.bf16.mxu1 %v6677_v20  ;;  %v6723_v20 = vld [vmem:[#allocation8 + $0x650] ss:$12 sps:$4 sm:$0xff]  }
 0x286   : > { %4677 = vmatpush1.bf16.msra.mxu0 %v6674_v22  ;;  %v6726_v22 = vld [vmem:[#allocation8 + $0x5bc] ss:$12 sps:$4 sm:$0xff]  }
 0x287   : > { %5822 = vmatpush3.bf16.msra.mxu1 %v6678_v23  ;;  %4678 = vmatprep.subr.bf16.mxu0 %v6681_v24  ;;  %v6727_v23 = vld [vmem:[#allocation8 + $0x728] ss:$12 sps:$4 sm:$0xff]   ;;  %v6724_v24 = vld [vmem:[#allocation8 + $0x5b8] ss:$12 sps:$4 sm:$0xff]  }
 0x288   : > { %5823 = vmatprep.subr.bf16.mxu1 %v6682_v27  ;;  %v6728_v27 = vld [vmem:[#allocation8 + $0x668] ss:$12 sps:$4 sm:$0xff]  }
 0x28a   : > { %4679 = vmatpush1.bf16.msra.mxu0 %v6679_v28  ;;  %v6731_v28 = vld [vmem:[#allocation8 + $0x5d4] ss:$12 sps:$4 sm:$0xff]  }
 0x28b   : > { %5824 = vmatpush3.bf16.msra.mxu1 %v6683_v29  ;;  %4680 = vmatprep.subr.bf16.mxu0 %v6686_v30  ;;  %v6732_v29 = vld [vmem:[#allocation8 + $0x740] ss:$12 sps:$4 sm:$0xff]   ;;  %v6729_v30 = vld [vmem:[#allocation8 + $0x5d0] ss:$12 sps:$4 sm:$0xff]  }
 0x28c   : > { %5825 = vmatprep.subr.bf16.mxu1 %v6687_v31  ;;  %v6733_v31 = vld [vmem:[#allocation8 + $0x680] ss:$12 sps:$4 sm:$0xff]  }
 0x28e   : > { %4681 = vmatpush1.bf16.msra.mxu0 %v6684_v33  ;;  %v6736_v33 = vld [vmem:[#allocation8 + $0x5ec] ss:$12 sps:$4 sm:$0xff]  }
 0x28f   : > { %5826 = vmatpush3.bf16.msra.mxu1 %v6688_v35  ;;  %4682 = vmatprep.subr.bf16.mxu0 %v6691_v36  ;;  %v6737_v35 = vld [vmem:[#allocation8 + $0x758] ss:$12 sps:$4 sm:$0xff]   ;;  %v6734_v36 = vld [vmem:[#allocation8 + $0x5e8] ss:$12 sps:$4 sm:$0xff]  }
 0x290   : > { %v2415_v47 = vpop.f32.mrb[8].mxu1  ;;  %5827 = vmatprep.subr.bf16.mxu1 %v6692_v38  ;;  %v6741_v38 = vld [vmem:[#allocation8 + $0x604] ss:$12 sps:$4 sm:$0xff]  }
 0x291   : > { %v2417_v52 = vpop.f32.mrb[9].mxu1  ;;  %v5889_v58 = vadd.f32 %v2415_v47, %v621_v46  ;;  %v6768_v47 = vld [vmem:[#allocation8 + $0x848] ss:$12 sps:$4 sm:$0xff]  }
 0x292   : > { %v5890_v53 = vadd.f32 %v2417_v52, %v625_v42  ;;  %4683 = vmatpush1.bf16.msra.mxu0 %v6689_v40  ;;  %v2419_v54 = vpop.f32.mrb[10].mxu1  ;;  %v5891_v40 = vadd.f32 %v7416_v10, %v629_v34  ;;  %v6739_v42 = vld [vmem:[#allocation8 + $0x600] ss:$12 sps:$4 sm:$0xff]  }
 0x293   : > { %5828 = vmatpush3.bf16.msra.mxu1 %v6693_v43  ;;  %v2420_v56 = vpop.f32.mrb[11].mxu1  ;;  %4684 = vmatprep.subr.bf16.mxu0 %v6696_v44  ;;  %v2592_v2 = vmax.f32 %v5889_v58, 0.0  ;;  %v6743_v43 = vld [vmem:[#allocation8 + $0x6b0] ss:$12 sps:$4 sm:$0xff]   ;;  %v6749_v10 = vld [vmem:[#allocation8 + $0x634] ss:$12 sps:$4 sm:$0xff]  }
 0x294   : > { %v2593_v60 = vmax.f32 %v5890_v53, 0.0  ;;  %5829 = vmatprep.subr.bf16.mxu1 %v6697_v48  ;;  %v6746_v44 = vld [vmem:[#allocation8 + $0x61c] ss:$12 sps:$4 sm:$0xff]   ;;  %v2594_v46 = vmax.f32 %v5891_v40, 0.0  ;;  %v6744_v48 = vld [vmem:[#allocation8 + $0x618] ss:$12 sps:$4 sm:$0xff]  }
 0x295   : > { %v7432_v11 = vpack.c.bf16 %v2592_v2, %v2592_v2  ;;  %v6773_v53 = vld [vmem:[#allocation8 + $0x860] ss:$12 sps:$4 sm:$0xff]   ;;  %v6747_v54 = vld [vmem:[#allocation8 + $0x630] ss:$12 sps:$4 sm:$0xff]  }
 0x296   : > { %v2605_v63 = vpack.c.bf16 %v2593_v60, %v2593_v60  ;;  %4685 = vmatpush1.bf16.msra.mxu0 %v6694_v55  ;;  %v7443_v52 = vpack.c.bf16 %v2594_v46, %v2594_v46  ;;  %v6752_v55 = vld [vmem:[#allocation8 + $0x64c] ss:$12 sps:$4 sm:$0xff]   ;;  %v6755_v58 = vld [vmem:[#allocation8 + $0x664] ss:$12 sps:$4 sm:$0xff]   ;;  %v6761_v2 = vld [vmem:[#allocation8 + $0x694] ss:$12 sps:$4 sm:$0xff]  }
 0x297   : > { %5830 = vmatpush3.bf16.msra.mxu1 %v6698_v26  ;;  %4686 = vmatprep.subr.bf16.mxu0 %v6701_v57  ;;  %v6774_v56 = vld [vmem:[#allocation8 + $0x7a0] ss:$12 sps:$4 sm:$0xff]   ;;  %v6778_v26 = vld [vmem:[#allocation8 + $0x878] ss:$12 sps:$4 sm:$0xff]   ;;  %v6750_v57 = vld [vmem:[#allocation8 + $0x648] ss:$12 sps:$4 sm:$0xff]  }
 0x298   : > { %4702 = vmatprep.mubr.bf16.mxu0 %v2605_v63  ;;  %4945 = vmatprep.mubr.bf16.mxu1 %v2605_v63  ;;  %v6779_v60 = vld [vmem:[#allocation8 + $0x7b8] ss:$12 sps:$4 sm:$0xff]   ;;  %v6758_v63 = vld [vmem:[#allocation8 + $0x67c] ss:$12 sps:$4 sm:$0xff]  }
 0x299   : > { %5831 = vmatprep.subr.bf16.mxu1 %v6702_v62  ;;  %v6753_v62 = vld [vmem:[#allocation8 + $0x660] ss:$12 sps:$4 sm:$0xff]  }
 0x29a   : > { %4687 = vmatpush1.bf16.msra.mxu0 %v6699_v0  ;;  %v6784_v0 = vld [vmem:[#allocation8 + $0x7d0] ss:$12 sps:$4 sm:$0xff]  }
 0x29b   : > { %5832 = vmatpush3.bf16.msra.mxu1 %v6703_v59  ;;  %4688 = vmatprep.subr.bf16.mxu0 %v6706_v1  ;;  %v6788_v59 = vld [vmem:[#allocation8 + $0x8a8] ss:$12 sps:$4 sm:$0xff]   ;;  %v6756_v1 = vld [vmem:[#allocation8 + $0x678] ss:$12 sps:$4 sm:$0xff]  }
 0x29c   : > { %5839 = vmatprep.subr.bf16.mxu1 %v6707_v3  ;;  %v6789_v3 = vld [vmem:[#allocation8 + $0x7e8] ss:$12 sps:$4 sm:$0xff]  }
 0x29e   : > { %4689 = vmatpush1.bf16.msra.mxu0 %v6704_v4  ;;  %4946 = vmatmul.mubr.bf16.vlgmr.msra.gmra.mrb[28].mxu1 %v7432_v11  ;;  %v6759_v4 = vld [vmem:[#allocation8 + $0x690] ss:$12 sps:$4 sm:$0xff]  }
 0x29f   : > { %5840 = vmatpush3.bf16.msra.mxu1 %v6708_v5  ;;  %4985 = vmatprep.mubr.bf16.mxu1 %v7434_v25  ;;  %v6764_v5 = vld [vmem:[#allocation8 + $0x6ac] ss:$12 sps:$4 sm:$0xff]  }
 0x2a0   : > { %4690 = vmatprep.subr.bf16.mxu0 %v6711_v8  ;;  %5841 = vmatprep.subr.bf16.mxu1 %v6712_v9  ;;  %v6798_v8 = vld [vmem:[#allocation8 + $0x8d8] ss:$12 sps:$4 sm:$0xff]   ;;  %v6762_v9 = vld [vmem:[#allocation8 + $0x6a8] ss:$12 sps:$4 sm:$0xff]  }
 0x2a2   : > { %4691 = vmatpush1.bf16.msra.mxu0 %v6709_v7  ;;  %v6799_v7 = vld [vmem:[#allocation8 + $0x818] ss:$12 sps:$4 sm:$0xff]  }
 0x2a3   : > { %5842 = vmatpush3.bf16.msra.mxu1 %v6713_v12  ;;  %4692 = vmatprep.subr.bf16.mxu0 %v6716_v13  ;;  %v6803_v12 = vld [vmem:[#allocation8 + $0x8f0] ss:$12 sps:$4 sm:$0xff]   ;;  %v6765_v13 = vld [vmem:[#allocation8 + $0x6c0] ss:$12 sps:$4 sm:$0xff]  }
 0x2a4   : > { %5843 = vmatprep.subr.bf16.mxu1 %v6717_v14  ;;  %v6772_v14 = vld [vmem:[#allocation8 + $0x6dc] ss:$12 sps:$4 sm:$0xff]  }
 0x2a6   : > { %4693 = vmatpush1.bf16.msra.mxu0 %v6714_v15  ;;  %v6804_v15 = vld [vmem:[#allocation8 + $0x830] ss:$12 sps:$4 sm:$0xff]  }
 0x2a7   : > { %5844 = vmatpush3.bf16.msra.mxu1 %v6718_v16  ;;  %4694 = vmatprep.subr.bf16.mxu0 %v6721_v17  ;;  %v6770_v16 = vld [vmem:[#allocation8 + $0x6d8] ss:$12 sps:$4 sm:$0xff]   ;;  %v6777_v17 = vld [vmem:[#allocation8 + $0x6f4] ss:$12 sps:$4 sm:$0xff]  }
 0x2a8   : > { %5845 = vmatprep.subr.bf16.mxu1 %v6722_v18  ;;  %v6775_v18 = vld [vmem:[#allocation8 + $0x6f0] ss:$12 sps:$4 sm:$0xff]  }
 0x2aa   : > { %4695 = vmatpush1.bf16.msra.mxu0 %v6719_v19  ;;  %v6782_v19 = vld [vmem:[#allocation8 + $0x70c] ss:$12 sps:$4 sm:$0xff]  }
 0x2ab   : > { %5846 = vmatpush3.bf16.msra.mxu1 %v6723_v20  ;;  %4696 = vmatprep.subr.bf16.mxu0 %v6726_v22  ;;  %v6780_v20 = vld [vmem:[#allocation8 + $0x708] ss:$12 sps:$4 sm:$0xff]   ;;  %v6787_v22 = vld [vmem:[#allocation8 + $0x724] ss:$12 sps:$4 sm:$0xff]  }
 0x2ac   : > { %5847 = vmatprep.subr.bf16.mxu1 %v6727_v23  ;;  %v6785_v23 = vld [vmem:[#allocation8 + $0x720] ss:$12 sps:$4 sm:$0xff]  }
 0x2ae   : > { %4697 = vmatpush1.bf16.msra.mxu0 %v6724_v24  ;;  %v6792_v24 = vld [vmem:[#allocation8 + $0x73c] ss:$12 sps:$4 sm:$0xff]  }
 0x2af   : > { %5848 = vmatpush3.bf16.msra.mxu1 %v6728_v27  ;;  %4698 = vmatprep.subr.bf16.mxu0 %v6731_v28  ;;  %v6790_v27 = vld [vmem:[#allocation8 + $0x738] ss:$12 sps:$4 sm:$0xff]   ;;  %v6797_v28 = vld [vmem:[#allocation8 + $0x754] ss:$12 sps:$4 sm:$0xff]  }
 0x2b0   : > { %5849 = vmatprep.subr.bf16.mxu1 %v6732_v29  ;;  %v637_v29 = vrot.slane %v7427_v39, %v7399_v32 }
 0x2b2   : > { %4699 = vmatpush1.bf16.msra.mxu0 %v6729_v30  ;;  %v6795_v30 = vld [vmem:[#allocation8 + $0x750] ss:$12 sps:$4 sm:$0xff]  }
 0x2b3   : > { %5850 = vmatpush3.bf16.msra.mxu1 %v6733_v31  ;;  %4700 = vmatprep.subr.bf16.mxu0 %v6736_v33  ;;  %v641_v31 = vrot.slane %v7427_v39, %v608_v6  ;;  %v6802_v33 = vld [vmem:[#allocation8 + $0x76c] ss:$12 sps:$4 sm:$0xff]   ;;  %v6810_v6 = vld [vmem:[#allocation8 + $0x79c] ss:$12 sps:$4 sm:$0xff]  }
 0x2b4   : > { %5851 = vmatprep.subr.bf16.mxu1 %v6737_v35  ;;  %v6808_v39 = vld [vmem:[#allocation8 + $0x798] ss:$12 sps:$4 sm:$0xff]  }
 0x2b6   : > { %4701 = vmatpush1.bf16.msra.mxu0 %v6734_v36 }
 0x2b7   : > { %5852 = vmatpush3.bf16.msra.mxu1 %v6738_v37  ;;  %4711 = vmatprep.subr.bf16.mxu0 %v6741_v38  ;;  %v6800_v38 = vld [vmem:[#allocation8 + $0x768] ss:$12 sps:$4 sm:$0xff]  }
 0x2b8   : > { %5853 = vmatprep.subr.bf16.mxu1 %v6742_v41 }
 0x2b9   : > { %4703 = vmatmul.mubr.bf16.vlgmr.msra.gmra.mrb[8].mxu0 %v7432_v11  ;;  %v6794_v11 = vld [vmem:[#allocation8 + $0x800] ss:$12 sps:$4 sm:$0xff]  }
 0x2ba   : > { %4712 = vmatpush1.bf16.msra.mxu0 %v6739_v42  ;;  %4743 = vmatprep.mubr.bf16.mxu0 %v7434_v25  ;;  %v6767_v25 = vld [vmem:[#allocation8 + $0x6c4] ss:$12 sps:$4 sm:$0xff]  }
 0x2bb   : > { %5854 = vmatpush3.bf16.msra.mxu1 %v6743_v43  ;;  %4713 = vmatprep.subr.bf16.mxu0 %v6746_v44  ;;  %v6807_v42 = vld [vmem:[#allocation8 + $0x784] ss:$12 sps:$4 sm:$0xff]  }
 0x2bc   : > { %5861 = vmatprep.subr.bf16.mxu1 %v6768_v47 }
 0x2be   : > { %4714 = vmatpush1.bf16.msra.mxu0 %v6744_v48  ;;  %4986 = vmatmul.mubr.bf16.vlgmr.msra.gmra.mrb[32].mxu1 %v7443_v52  ;;  %v6813_v48 = vld [vmem:[#allocation8 + $0x7b4] ss:$12 sps:$4 sm:$0xff]  }
 0x2bf   : > { %4715 = vmatprep.subr.bf16.mxu0 %v6749_v10  ;;  %5862 = vmatpush3.bf16.msra.mxu1 %v6769_v51  ;;  %v6811_v10 = vld [vmem:[#allocation8 + $0x7b0] ss:$12 sps:$4 sm:$0xff]   ;;  %v6816_v51 = vld [vmem:[#allocation8 + $0x7cc] ss:$12 sps:$4 sm:$0xff]  }
 0x2c0   : > { %5863 = vmatprep.subr.bf16.mxu1 %v6773_v53  ;;  %v6814_v53 = vld [vmem:[#allocation8 + $0x7c8] ss:$12 sps:$4 sm:$0xff]  }
 0x2c2   : > { %4716 = vmatpush1.bf16.msra.mxu0 %v6747_v54  ;;  %v6819_v54 = vld [vmem:[#allocation8 + $0x7e4] ss:$12 sps:$4 sm:$0xff]  }
 0x2c3   : > { %4717 = vmatprep.subr.bf16.mxu0 %v6752_v55  ;;  %5864 = vmatpush3.bf16.msra.mxu1 %v6774_v56  ;;  %v6817_v55 = vld [vmem:[#allocation8 + $0x7e0] ss:$12 sps:$4 sm:$0xff]   ;;  %v6822_v56 = vld [vmem:[#allocation8 + $0x7fc] ss:$12 sps:$4 sm:$0xff]  }
 0x2c4   : > { %5865 = vmatprep.subr.bf16.mxu1 %v6778_v26  ;;  %v6825_v26 = vld [vmem:[#allocation8 + $0x814] ss:$12 sps:$4 sm:$0xff]  }
 0x2c6   : > { %4718 = vmatpush1.bf16.msra.mxu0 %v6750_v57  ;;  %v6823_v57 = vld [vmem:[#allocation8 + $0x810] ss:$12 sps:$4 sm:$0xff]  }
 0x2c7   : > { %4719 = vmatprep.subr.bf16.mxu0 %v6755_v58  ;;  %5866 = vmatpush3.bf16.msra.mxu1 %v6779_v60  ;;  %v6828_v58 = vld [vmem:[#allocation8 + $0x82c] ss:$12 sps:$4 sm:$0xff]  }
 0x2c8   : > { %5867 = vmatprep.subr.bf16.mxu1 %v6783_v61 }
 0x2ca   : > { %4720 = vmatpush1.bf16.msra.mxu0 %v6753_v62  ;;  %v6826_v62 = vld [vmem:[#allocation8 + $0x828] ss:$12 sps:$4 sm:$0xff]  }
 0x2cb   : > { %4721 = vmatprep.subr.bf16.mxu0 %v6758_v63  ;;  %5868 = vmatpush3.bf16.msra.mxu1 %v6784_v0 }
 0x2cc   : > { %5869 = vmatprep.subr.bf16.mxu1 %v6788_v59  ;;  %v6831_v59 = vld [vmem:[#allocation8 + $0x844] ss:$12 sps:$4 sm:$0xff]  }
 0x2ce   : > { %4722 = vmatpush1.bf16.msra.mxu0 %v6756_v1 }
 0x2cf   : > { %4723 = vmatprep.subr.bf16.mxu0 %v6761_v2  ;;  %5870 = vmatpush3.bf16.msra.mxu1 %v6789_v3  ;;  %v6829_v2 = vld [vmem:[#allocation8 + $0x840] ss:$12 sps:$4 sm:$0xff]   ;;  %v6834_v3 = vld [vmem:[#allocation8 + $0x85c] ss:$12 sps:$4 sm:$0xff]  }
 0x2d0   : > { %5871 = vmatprep.subr.bf16.mxu1 %v6793_v49  ;;  %v6832_v49 = vld [vmem:[#allocation8 + $0x858] ss:$12 sps:$4 sm:$0xff]  }
 0x2d2   : > { %4724 = vmatpush1.bf16.msra.mxu0 %v6759_v4  ;;  %v6837_v4 = vld [vmem:[#allocation8 + $0x874] ss:$12 sps:$4 sm:$0xff]  }
 0x2d3   : > { %4725 = vmatprep.subr.bf16.mxu0 %v6764_v5  ;;  %5872 = vmatpush3.bf16.msra.mxu1 %v6794_v11  ;;  %v6835_v5 = vld [vmem:[#allocation8 + $0x870] ss:$12 sps:$4 sm:$0xff]   ;;  %v6840_v11 = vld [vmem:[#allocation8 + $0x88c] ss:$12 sps:$4 sm:$0xff]  }
 0x2d4   : > { %5873 = vmatprep.subr.bf16.mxu1 %v6798_v8  ;;  %v6838_v8 = vld [vmem:[#allocation8 + $0x888] ss:$12 sps:$4 sm:$0xff]  }
 0x2d6   : > { %4726 = vmatpush1.bf16.msra.mxu0 %v6762_v9  ;;  %v6843_v9 = vld [vmem:[#allocation8 + $0x8a4] ss:$12 sps:$4 sm:$0xff]  }
 0x2d7   : > { %4727 = vmatprep.subr.bf16.mxu0 %v6767_v25  ;;  %5874 = vmatpush3.bf16.msra.mxu1 %v6799_v7  ;;  %v6841_v25 = vld [vmem:[#allocation8 + $0x8a0] ss:$12 sps:$4 sm:$0xff]   ;;  %v6846_v7 = vld [vmem:[#allocation8 + $0x8bc] ss:$12 sps:$4 sm:$0xff]  }
 0x2d8   : > { %5875 = vmatprep.subr.bf16.mxu1 %v6803_v12  ;;  %v6844_v12 = vld [vmem:[#allocation8 + $0x8b8] ss:$12 sps:$4 sm:$0xff]  }
 0x2da   : > { %4728 = vmatpush1.bf16.msra.mxu0 %v6765_v13  ;;  %v6849_v13 = vld [vmem:[#allocation8 + $0x8d4] ss:$12 sps:$4 sm:$0xff]  }
 0x2db   : > { %4729 = vmatprep.subr.bf16.mxu0 %v6772_v14  ;;  %5876 = vmatpush3.bf16.msra.mxu1 %v6804_v15  ;;  %v2994_v14 = vld [vmem:[#allocation10] sm:$0x7]  ;;  %v6847_v15 = vld [vmem:[#allocation8 + $0x8d0] ss:$12 sps:$4 sm:$0xff]  }
 0x2de   : > { %4730 = vmatpush1.bf16.msra.mxu0 %v6770_v16  ;;  %v3007_v16 = vrot.slane %v2994_v14, %v7399_v32 }
 0x2df   : > { %4731 = vmatprep.subr.bf16.mxu0 %v6777_v17  ;;  %v6852_v17 = vld [vmem:[#allocation8 + $0x8ec] ss:$12 sps:$4 sm:$0xff]  }
 0x2e2   : > { %4732 = vmatpush1.bf16.msra.mxu0 %v6775_v18 }
 0x2e3   : > { %4733 = vmatprep.subr.bf16.mxu0 %v6782_v19 }
 0x2e6   : > { %4734 = vmatpush1.bf16.msra.mxu0 %v6780_v20  ;;  %v6850_v20 = vld [vmem:[#allocation8 + $0x8e8] ss:$12 sps:$4 sm:$0xff]  }
 0x2e7   : > { %4735 = vmatprep.subr.bf16.mxu0 %v6787_v22 }
 0x2ea   : > { %4736 = vmatpush1.bf16.msra.mxu0 %v6785_v23 }
 0x2eb   : > { %4737 = vmatprep.subr.bf16.mxu0 %v6792_v24 }
 0x2ee   : > { %4738 = vmatpush1.bf16.msra.mxu0 %v6790_v27 }
 0x2ef   : > { %4739 = vmatprep.subr.bf16.mxu0 %v6797_v28 }
 0x2f0   : > { %v2579_v34 = vpop.f32.mrb[12].mxu1 }
 0x2f1   : > { %v5893_v35 = vadd.f32 %v2579_v34, %v637_v29  ;;  %v2581_v36 = vpop.f32.mrb[13].mxu1 }
 0x2f2   : > { %v5894_v37 = vadd.f32 %v2581_v36, %v641_v31  ;;  %4740 = vmatpush1.bf16.msra.mxu0 %v6795_v30  ;;  %v2583_v40 = vpop.f32.mrb[14].mxu1 }
 0x2f3   : > { %v2596_v41 = vmax.f32 %v5893_v35, 0.0  ;;  %4741 = vmatprep.subr.bf16.mxu0 %v6802_v33  ;;  %v2584_v43 = vpop.f32.mrb[15].mxu1 }
 0x2f4   : > { %v2597_v44 = vmax.f32 %v5894_v37, 0.0 }
 0x2f5   : > { %v7451_v46 = vpack.c.bf16 %v2596_v41, %v2596_v41 }
 0x2f6   : > { %v2609_v47 = vpack.c.bf16 %v2597_v44, %v2597_v44  ;;  %4742 = vmatpush1.bf16.msra.mxu0 %v6800_v38 }
 0x2f7   : > { %4752 = vmatprep.subr.bf16.mxu0 %v6807_v42 }
 0x2f8   : > { %5025 = vmatprep.mubr.bf16.mxu1 %v2609_v47 }
 0x2f9   : > { %4744 = vmatmul.mubr.bf16.vlgmr.msra.gmra.mrb[8].mxu0 %v7443_v52  ;;  %5026 = vmatmul.mubr.bf16.vlgmr.msra.gmra.mrb[36].mxu1 %v7451_v46  ;;  %v6820_v52 = vld [vmem:[#allocation8 + $0x7f8] ss:$12 sps:$4 sm:$0xff]  }
 0x2fa   : > { %4753 = vmatpush1.bf16.msra.mxu0 %v6805_v45  ;;  %4784 = vmatprep.mubr.bf16.mxu0 %v2609_v47 }
 0x2fb   : > { %4754 = vmatprep.subr.bf16.mxu0 %v6810_v6 }
 0x2fe   : > { %4755 = vmatpush1.bf16.msra.mxu0 %v6808_v39 }
 0x2ff   : > { %4756 = vmatprep.subr.bf16.mxu0 %v6813_v48 }
 0x302   : > { %4757 = vmatpush1.bf16.msra.mxu0 %v6811_v10 }
 0x303   : > { %4758 = vmatprep.subr.bf16.mxu0 %v6816_v51 }
 0x306   : > { %4759 = vmatpush1.bf16.msra.mxu0 %v6814_v53 }
 0x307   : > { %4760 = vmatprep.subr.bf16.mxu0 %v6819_v54  ;;  %v2999_v54 = vrot.slane %v2994_v14, %v7374_v50 }
 0x30a   : > { %4761 = vmatpush1.bf16.msra.mxu0 %v6817_v55  ;;  %v3003_v55 = vrot.slane %v2994_v14, %v7377_v21 }
 0x30b   : > { %4762 = vmatprep.subr.bf16.mxu0 %v6822_v56 }
 0x30e   : > { %4763 = vmatpush1.bf16.msra.mxu0 %v6820_v52 }
 0x30f   : > { %4764 = vmatprep.subr.bf16.mxu0 %v6825_v26 }
 0x311   : > { %v5767_v60 = vpop.f32.mrb[16].mxu1 }
 0x312   : > { %4765 = vmatpush1.bf16.msra.mxu0 %v6823_v57  ;;  %v5768_v61 = vpop.f32.mrb[17].mxu1 }
 0x313   : > { %v5769_v63 = vadd.f32 %v5768_v61, %v5767_v60  ;;  %v5770_v0 = vpop.f32.mrb[18].mxu1  ;;  %4766 = vmatprep.subr.bf16.mxu0 %v6828_v58 }
 0x314   : > { %v5771_v1 = vpop.f32.mrb[19].mxu1 }
 0x315   : > { %v4828_v22 = vadd.f32 %v5769_v63, %v3007_v16 }
 0x316   : > { %4767 = vmatpush1.bf16.msra.mxu0 %v6826_v62 }
 0x317   : > { %4768 = vmatprep.subr.bf16.mxu0 %v6831_v59 }
 0x31a   : > { %4769 = vmatpush1.bf16.msra.mxu0 %v6829_v2 }
 0x31b   : > { %4770 = vmatprep.subr.bf16.mxu0 %v6834_v3 }
 0x31e   : > { %4771 = vmatpush1.bf16.msra.mxu0 %v6832_v49 }
 0x31f   : > { %4772 = vmatprep.subr.bf16.mxu0 %v6837_v4 }
 0x322   : > { %4773 = vmatpush1.bf16.msra.mxu0 %v6835_v5 }
 0x323   : > { %4774 = vmatprep.subr.bf16.mxu0 %v6840_v11 }
 0x326   : > { %4775 = vmatpush1.bf16.msra.mxu0 %v6838_v8 }
 0x327   : > { %4776 = vmatprep.subr.bf16.mxu0 %v6843_v9 }
 0x32a   : > { %4777 = vmatpush1.bf16.msra.mxu0 %v6841_v25 }
 0x32b   : > { %4778 = vmatprep.subr.bf16.mxu0 %v6846_v7 }
 0x32e   : > { %4779 = vmatpush1.bf16.msra.mxu0 %v6844_v12 }
 0x32f   : > { %4780 = vmatprep.subr.bf16.mxu0 %v6849_v13 }
 0x331   : > { %v5789_v18 = vpop.f32.mrb[20].mxu1 }
 0x332   : > { %4781 = vmatpush1.bf16.msra.mxu0 %v6847_v15  ;;  %v5790_v19 = vpop.f32.mrb[21].mxu1 }
 0x333   : > { %v5791_v23 = vadd.f32 %v5790_v19, %v5789_v18  ;;  %v5792_v24 = vpop.f32.mrb[22].mxu1  ;;  %4782 = vmatprep.subr.bf16.mxu0 %v6852_v17 }
 0x334   : > { %v5793_v27 = vpop.f32.mrb[23].mxu1 }
 0x335   : > { %v4868_v28 = vadd.f32 %v5791_v23, %v4828_v22 }
 0x336   : > { %4783 = vmatpush1.bf16.msra.mxu0 %v6850_v20 }
 0x339   : > { %4785 = vmatmul.mubr.bf16.vlgmr.msra.gmra.mrb[8].mxu0 %v7451_v46 }
 0x351   : > { %v5811_v29 = vpop.f32.mrb[24].mxu1 }
 0x352   : > { %v5812_v30 = vpop.f32.mrb[25].mxu1 }
 0x353   : > { %v5813_v31 = vadd.f32 %v5812_v30, %v5811_v29  ;;  %v5814_v33 = vpop.f32.mrb[26].mxu1 }
 0x354   : > { %v5815_v32 = vpop.f32.mrb[27].mxu1 }
 0x355   : > { %v4908_v34 = vadd.f32 %v5813_v31, %v4868_v28 }
 0x371   : > { %v5833_v35 = vpop.f32.mrb[28].mxu1 }
 0x372   : > { %v5834_v36 = vpop.f32.mrb[29].mxu1 }
 0x373   : > { %v5835_v37 = vadd.f32 %v5834_v36, %v5833_v35  ;;  %v5836_v38 = vpop.f32.mrb[30].mxu1 }
 0x374   : > { %v5837_v40 = vpop.f32.mrb[31].mxu1 }
 0x375   : > { %v4948_v41 = vadd.f32 %v5835_v37, %v4908_v34 }
 0x391   : > { %v5855_v42 = vpop.f32.mrb[32].mxu1 }
 0x392   : > { %v5856_v43 = vpop.f32.mrb[33].mxu1 }
 0x393   : > { %v5857_v44 = vadd.f32 %v5856_v43, %v5855_v42  ;;  %v5858_v47 = vpop.f32.mrb[34].mxu1 }
 0x394   : > { %v5859_v45 = vpop.f32.mrb[35].mxu1 }
 0x395   : > { %v4988_v46 = vadd.f32 %v5857_v44, %v4948_v41 }
 0x3cc   : > { %v5877_v6 = vpop.f32.mrb[36].mxu1 }
 0x3cd   : > { %v5878_v39 = vpop.f32.mrb[37].mxu1 }
 0x3ce   : > { %v5879_v48 = vadd.f32 %v5878_v39, %v5877_v6  ;;  %v5880_v10 = vpop.f32.mrb[38].mxu1 }
 0x3cf   : > { %v5881_v51 = vpop.f32.mrb[39].mxu1 }
 0x3d0   : > { %v5028_v53 = vadd.f32 %v5879_v48, %v4988_v46 }
 0x3d2   : > { %5035 = vst [vmem:[%s294_s25 + $0x10] sm:$0xff] %v5028_v53 }
 0x40c   : > { %v4786_v56 = vpop.f32.mrb[8].mxu0 }
 0x40d   : > { %v5895_v52 = vadd.f32 %v4786_v56, %v2999_v54  ;;  %v4788_v26 = vpop.f32.mrb[9].mxu0 }
 0x40e   : > { %v5896_v57 = vadd.f32 %v4788_v26, %v3003_v55  ;;  %v4790_v58 = vpop.f32.mrb[10].mxu0 }
 0x40f   : > { %5033 = vst [vmem:[%s294_s25] sm:$0xff] %v5895_v52  ;;  %v4791_v50 = vpop.f32.mrb[11].mxu0 }
 0x410   : > { %5034 = vst [vmem:[%s294_s25 + $0x8] sm:$0xff] %v5896_v57 }
 0x411   : > { %7009 = shalt.err (!%p7006_p12)
}
 0x412   : > { %s7010_s17 = scalar_lea.hbm %s7465_s29, 384  ;;  %s7014_s11 = scalar_lea.hbm %s7514_s5, 768 }
 0x413   : > { %p7011_p13 = scmp.ne.s32.totalorder %s7465_s29, %s7010_s17  ;;  %p7015_p9 = scmp.lt.u32.totalorder %s7465_s29, %s7514_s5 }
 0x414   : > { %p7016_p4 = scmp.lt.u32.totalorder %s7014_s11, %s7010_s17  ;;  %p7018_p0 = scmp.lt.u32.totalorder %s7010_s17, %s7465_s29 }
 0x415   : > { %p7012_p1 = pnand %p7011_p13, %p7531_p6 }
 0x416   : > { %p7017_p8 = por %p7016_p4, %p7015_p9 }
 0x417   : > { %p7013_p7 = pneg %p7012_p1 }
 0x418   : > { %p7019_p2 = por %p7018_p0, %p7017_p8 }
 0x41a   : > { %p7020_p5 = pnand %p7019_p2, %p7013_p7 }
 0x41c   : > { %7023 = shalt.err (!%p7020_p5)
}
 0x41d   : > { %5963 = dma.vmem_to_hbm [thread:$0]  (%p7531_p6), %s7467_s15, 384, %s7465_s29, %s5037_s24  }
 0x41e PF: > { %s5063_s25 = sand.u32 1, %s7058_s18   ;;  %p7532_p10 = scmp.ne.s32.totalorder %s7524_s12, 0 }
 0x41f   : > { %p7533_p11 = scmp.ge.s32.totalorder %s7070_s21, 2  ;;  %s5064_s9 = scalar_lea.sflag [#allocation4], %s5063_s25 }
 0x421   : > { %p5983_p3 = pnand %p7533_p11, %p7532_p10 }
 0x423   : > { %7053 = dma.done.wait (!%p5983_p3), %s5064_s9, 384  }
 0x424   : > { %7055 = vsyncadd (!%p5983_p3), %s5064_s9, 4294966912  ;;  %p20_p12 = scmp.ge.s32.totalorder %s7249_s28, 4   ;;  %s7534_s18 = smov %s7062_s19 }
 0x425   : > { %s7535_s19 = smov %s7066_s20  ;;  %s7536_s20 = smov %s7260_s27 }
 0x426   : > { %s7537_s21 = smov %s7249_s28  ;;  %22 = sbr.rel (!%p20_p12) target bundleno = 7 (0x7), region = 101 }
 0x42d   :  { %5069 = vsyncpa [#allocation3], 1 }
 0x42e   :  { %5071 = vsyncpa [#allocation3 + $0x1], 1 }
 0x42f   :  { %5072 = vsyncpa [#allocation6], 1 }
 0x430   :  { %5073 = vsyncpa [#allocation9], 1 }
 0x431   :  { %5074 = vsyncpa [#allocation4], 1 }
 0x432   :  { %5076 = vsyncpa [#allocation4 + $0x1], 1 }

</bundles_post_ra>
